<compile_context>
chip_gen: v5e
topology: v5e:2x2
jax: 0.10.0
libtpu: 0.0.40
codegen_flags: <defaults>
</compile_context>

<pallas_src>
import math

import numpy as np

import jax
import jax.numpy as jnp
from jax.experimental import pallas as pl
from jax.experimental.pallas import tpu as pltpu

EPS = 1e-5  # PyTorch BatchNorm default eps


# ---------------------------------------------------------------------------
# Glue-side packing helpers (numpy, tiny weight tensors only)
# ---------------------------------------------------------------------------
def _toeplitz(w, width):
    """(Cout, Cin, KH, KW) torch conv weight -> (KH, width*Cin, width*Cout).

    KW taps and horizontal 'same' zero-padding folded into a block-Toeplitz matrix, so one
    matmul per vertical tap handles a whole row."""
    w = np.asarray(w, np.float32)
    cout, cin, kh_n, kw_n = w.shape
    pw = kw_n // 2
    t = np.zeros((kh_n, width * cin, width * cout), np.float32)
    for kh in range(kh_n):
        for wo in range(width):
            for kw in range(kw_n):
                wi = wo + kw - pw
                if 0 <= wi < width:
                    t[kh, wi * cin:(wi + 1) * cin, wo * cout:(wo + 1) * cout] = w[:, :, kh, kw].T
    return t


def _toeplitz_k(w_parts, width):
    """K-stacked Toeplitz weights: blocks ordered part-major, vertical-tap-minor.

    Matches the in-kernel slab assembly, so the whole conv (all KH taps, all channel-concat
    parts) is a single matmul with K = KH * sum_i(width * Cin_i)."""
    blocks = []
    for w in w_parts:
        t = _toeplitz(w, width)                    # (KH, width*Cin_i, width*Cout)
        blocks.extend(t[k] for k in range(t.shape[0]))
    return np.concatenate(blocks, axis=0)          # (KH*sum(width*Cin_i), width*Cout)


def _epilogue(bias, scale, shift, width):
    """(3, width*Cout): rows = [bias, bn_scale, bn_shift], tiled over the W lane blocks."""
    return np.stack([np.tile(np.asarray(bias, np.float32), width),
                     np.tile(np.asarray(scale, np.float32), width),
                     np.tile(np.asarray(shift, np.float32), width)], 0)


def _row_even_select(h):
    """(h//2, h) selector picking even rows (the valid rows after the in-kernel row-pair max)."""
    ho = h // 2
    r = np.zeros((ho, h), np.float32)
    for i in range(ho):
        r[i, 2 * i] = 1.0
    return r


def _pool_col_select(width, c):
    """Even / odd column-block lane selectors for 2x lane (W) max pooling."""
    wo = width // 2
    ce = np.zeros((width * c, wo * c), np.float32)
    co = np.zeros((width * c, wo * c), np.float32)
    for j in range(wo):
        for ch in range(c):
            ce[(2 * j) * c + ch, j * c + ch] = 1.0
            co[(2 * j + 1) * c + ch, j * c + ch] = 1.0
    return ce, co


def _up2_coeff(n_in):
    """1-D exact-2x bilinear weights, PyTorch align_corners=False: (2*n_in, n_in)."""
    m = np.zeros((2 * n_in, n_in), np.float32)
    for o in range(2 * n_in):
        src = max((o + 0.5) * 0.5 - 0.5, 0.0)
        i0 = min(int(math.floor(src)), n_in - 1)
        lam = src - i0
        i1 = min(i0 + 1, n_in - 1)
        m[o, i0] += 1.0 - lam
        m[o, i1] += lam
    return m


def _up2_lane(width, c):
    """(width*c, 2*width*c): lane-axis (W) bilinear 2x interpolation for row slabs."""
    coeff = _up2_coeff(width)
    u = np.zeros((width * c, 2 * width * c), np.float32)
    for wo in range(2 * width):
        for wi in range(width):
            v = coeff[wo, wi]
            if v:
                for ch in range(c):
                    u[wi * c + ch, wo * c + ch] = v
    return u


def _bn_eval(c):
    gamma = np.ones((c,), np.float32)
    beta = np.zeros((c,), np.float32)   # UNetClassify zeroes every parameter named '*.bias'
    mean = np.zeros((c,), np.float32)
    var = np.ones((c,), np.float32)
    scale = gamma / np.sqrt(var + EPS)
    shift = beta - mean * scale
    return scale, shift


# ---------------------------------------------------------------------------
# Deterministic parameters (shapes follow the PyTorch module, layers=2, init_filters=4)
# ---------------------------------------------------------------------------
def init_params(layers=2, init_filters=4, in_channels=4, depth_k=2, init_val=0.5):
    assert layers == 2 and init_filters == 4, "fused kernel is specialised to layers=2, init_filters=4"
    rng = np.random.default_rng(42)

    def conv_w(cout, cin, kh, kw):
        std = 1.0 / math.sqrt(cin * kh * kw)
        return (std * rng.standard_normal((cout, cin, kh, kw))).astype(np.float32)

    p = {"data_norm": _bn_eval(in_channels)}
    std3 = 1.0 / math.sqrt(in_channels * depth_k * 7 * 7)
    p["init_w"] = (std3 * rng.standard_normal((init_filters, in_channels, depth_k, 7, 7))).astype(np.float32)
    p["init_b"] = np.zeros((init_filters,), np.float32)
    p["init_norm"] = _bn_eval(init_filters)

    downs, f = [], init_filters
    for _ in range(layers - 1):                                   # UNetDownBlock(f, 2f), pool
        downs.append(dict(conv1_w=conv_w(2 * f, f, 3, 3), conv1_b=np.zeros((2 * f,), np.float32),
                          bn1=_bn_eval(2 * f),
                          conv2_w=conv_w(2 * f, 2 * f, 3, 3), conv2_b=np.zeros((2 * f,), np.float32),
                          bn2=_bn_eval(2 * f)))
        f *= 2
    downs.append(dict(conv1_w=conv_w(2 * f, f, 3, 3), conv1_b=np.zeros((2 * f,), np.float32),
                      bn1=_bn_eval(2 * f),
                      conv2_w=conv_w(2 * f, 2 * f, 3, 3), conv2_b=np.zeros((2 * f,), np.float32),
                      bn2=_bn_eval(2 * f)))                       # last down block, no pool
    p["downs"] = downs

    ups, fs = [], f
    for _ in range(layers):                                       # UNetUpBlock(2*fs, fs)
        fin, fout = 2 * fs, fs
        ups.append(dict(upconv_w=conv_w(fin // 2, fin, 3, 3), upconv_b=np.zeros((fin // 2,), np.float32),
                        upnorm=_bn_eval(fin // 2),
                        conv1_w=conv_w(fout, fin, 3, 3), conv1_b=np.zeros((fout,), np.float32),
                        bn1=_bn_eval(fout),
                        conv2_w=conv_w(fout, fout, 3, 3), conv2_b=np.zeros((fout,), np.float32),
                        bn2=_bn_eval(fout)))
        fs //= 2
    p["ups"] = ups

    p["out_w"] = conv_w(1, init_filters, 3, 3)
    # UNetClassify output bias init: -log((1-init_val)/init_val) (== 0 for init_val=0.5)
    p["out_b"] = np.full((1,), -math.log((1 - init_val) / init_val), np.float32)
    return p


def pack_params(p, height=16, width=16):
    """Build the 29 constant operands of the fused kernel (order matches the kernel signature)."""
    d, c_in, f = 2, 4, 4

    # --- fold data_norm (BatchNorm3d(4), eval) into the init conv -------------------------
    dn_scale, dn_shift = p["data_norm"]
    w3 = np.asarray(p["init_w"], np.float32)                                  # (F, C, KD, 7, 7)
    w2d = np.transpose(w3, (0, 2, 1, 3, 4)).reshape(f, d * c_in, 7, 7)        # packed ch = kd*C + c
    sp = np.tile(np.asarray(dn_scale, np.float32), d)
    tp = np.tile(np.asarray(dn_shift, np.float32), d)
    b_init = np.asarray(p["init_b"], np.float32) + np.einsum("fpkl,p->f", w2d, tp)
    w2d = w2d * sp[None, :, None, None]

    in_s, in_t = p["init_norm"]
    d0, d1 = p["downs"]
    u0, u1 = p["ups"]
    wh = width // 2
    ce, co = _pool_col_select(width, 8)           # pooled tensor: 8 channels @ 16x16 -> 8x8

    # output conv padded from 1 to 8 channels so the final store is lane-dense (channel 0 real).
    out_w8 = np.concatenate([np.asarray(p["out_w"], np.float32),
                             np.zeros((7, f, 3, 3), np.float32)], axis=0)
    out_b8 = np.concatenate([np.asarray(p["out_b"], np.float32), np.zeros((7,), np.float32)])

    def W(parts, wdt):                            # K-stacked Toeplitz weights, bf16 for the MXU
        return jnp.asarray(_toeplitz_k(parts, wdt), jnp.bfloat16)

    def E(bias, scale, shift, wdt):               # f32 epilogue (bias / bn scale / bn shift)
        return jnp.asarray(_epilogue(bias, scale, shift, wdt), jnp.float32)

    consts = [
        jnp.asarray(_row_even_select(height), jnp.float32),                   # rsel (8, 16)
        jnp.asarray(ce, jnp.float32), jnp.asarray(co, jnp.float32),           # cpe, cpo
        jnp.asarray(_up2_coeff(height // 2), jnp.float32),                    # uph (16, 8)
        jnp.asarray(_up2_lane(wh, 8), jnp.float32),                           # upw (64, 128)
        W([w2d], width), E(b_init, in_s, in_t, width),                        # init conv (+init_norm)
        W([d0["conv1_w"]], width), E(d0["conv1_b"], *d0["bn1"], width),
        W([d0["conv2_w"]], width), E(d0["conv2_b"], *d0["bn2"], width),
        W([d1["conv1_w"]], wh), E(d1["conv1_b"], *d1["bn1"], wh),
        W([d1["conv2_w"]], wh), E(d1["conv2_b"], *d1["bn2"], wh),
        W([u0["upconv_w"]], wh), E(u0["upconv_b"], *u0["upnorm"], wh),
        W([np.asarray(u0["conv1_w"])[:, :8], np.asarray(u0["conv1_w"])[:, 8:]], wh),  # cat split
        E(u0["conv1_b"], *u0["bn1"], wh),
        W([u0["conv2_w"]], wh), E(u0["conv2_b"], *u0["bn2"], wh),
        W([u1["upconv_w"]], width), E(u1["upconv_b"], *u1["upnorm"], width),
        W([np.asarray(u1["conv1_w"])[:, :4], np.asarray(u1["conv1_w"])[:, 4:]], width),
        E(u1["conv1_b"], *u1["bn1"], width),
        W([u1["conv2_w"]], width), E(u1["conv2_b"], *u1["bn2"], width),
        W([out_w8], width),
        E(out_b8, np.ones(8, np.float32), np.zeros(8, np.float32), width),
    ]
    assert len(consts) == 29
    return consts


# ---------------------------------------------------------------------------
# The fused kernel: whole forward pass for one batch element (grid axis = N, "parallel")
# ---------------------------------------------------------------------------
def _unet_kernel(x_ref,
                 rsel, cpe, cpo, uph, upw,
                 t_init, e_init,
                 t_d0c1, e_d0c1, t_d0c2, e_d0c2,
                 t_d1c1, e_d1c1, t_d1c2, e_d1c2,
                 t_u0up, e_u0up, t_u0c1, e_u0c1, t_u0c2, e_u0c2,
                 t_u1up, e_u1up, t_u1c1, e_u1c1, t_u1c2, e_u1c2,
                 t_out, e_out,
                 o_ref):
    f32 = jnp.float32
    bf16 = jnp.bfloat16

    def tap_slab(parts, kh):
        """Build the (H, kh*sum(W*Cin_i)) slab of vertically shifted, zero-padded copies.

        Pure slice / concat work (no MXU): zero-pad each part along H once, take the kh
        static sublane slices, and lane-concatenate part-major / tap-minor to match the
        K-stacked Toeplitz weights."""
        ph = kh // 2
        cols = []
        for x in parts:
            h_rows, wc = x.shape
            z = jnp.zeros((ph, wc), x.dtype)
            xp = jnp.concatenate([z, x, z], axis=0)          # 'same' zero padding along H
            for k in range(kh):
                cols.append(x if k == ph else xp[k:k + h_rows])
        return jnp.concatenate(cols, axis=1)

    def conv(parts, t_ref, ep_ref, kh=3, relu_bn=True):
        """'same' conv (+bias [-> ReLU -> eval BatchNorm]) on row-slab activations.

        parts : list of f32 (H, W*Cin_i) values; >1 entry implements torch.cat(..., dim=1)
                without materialising the concatenated tensor.
        t_ref : bf16 (kh*sum(W*Cin_i), W*Cout) K-stacked Toeplitz weights -> ONE MXU matmul.
        ep_ref: f32 (3, W*Cout) rows = [bias, bn_scale, bn_shift]; applied as
                conv + bias -> ReLU -> scale/shift, matching conv -> ReLU -> BatchNorm (eval).
        """
        slab = tap_slab(parts, kh).astype(bf16)
        acc = jnp.dot(slab, t_ref[...], preferred_element_type=f32)
        acc = acc + ep_ref[0:1, :]
        if relu_bn:
            acc = jnp.maximum(acc, 0.0)
            acc = acc * ep_ref[1:2, :] + ep_ref[2:3, :]
        return acc

    x_in = x_ref[0]                               # (16, 128): packed lane index = w*8 + (d*4 + c)

    # init_layer: Conv3d(4,4,(2,7,7),pad=(0,3,3)) == 7x7 conv over the 8 packed channels
    # (data_norm folded into t_init/e_init in glue), then ReLU, then init_norm.
    x0 = conv([x_in], t_init, e_init, kh=7)       # (16, 64)  : 4 ch @ 16x16 (skip for up block 1)

    # --- down block 0: UNetDownBlock(4, 8), MaxPool2d(2); Dropout = identity (eval) ---
    h = conv([x0], t_d0c1, e_d0c1)                # (16, 128) : 8 ch @ 16x16
    h = conv([h], t_d0c2, e_d0c2)                 # (16, 128)
    # maxpool 2x2: row pairs via shift + max (VPU) + even-row select; columns via lane selectors.
    h_dn = jnp.concatenate([h[1:], jnp.zeros((1, h.shape[1]), f32)], axis=0)
    hm = jnp.maximum(h, h_dn)                     # even rows hold max(row, row+1)
    hr = jnp.dot(rsel[...], hm, preferred_element_type=f32)                  # (8, 128)
    x1 = jnp.maximum(jnp.dot(hr, cpe[...], preferred_element_type=f32),
                     jnp.dot(hr, cpo[...], preferred_element_type=f32))      # (8, 64): 8 ch @ 8x8

    # --- down block 1: UNetDownBlock(8, 16, pool=False) ---
    h = conv([x1], t_d1c1, e_d1c1)                # (8, 128) : 16 ch @ 8x8
    x2 = conv([h], t_d1c2, e_d1c2)                # (8, 128)

    # --- up block 0: UNetUpBlock(16, 8); bilinear resize to the 8x8 skip size == identity ---
    # (skip order matches reversed([x0, x0, x1]) zipped with the two up layers -> x1 then x0)
    u = conv([x2], t_u0up, e_u0up)                # (8, 64) : 8 ch
    h = conv([u, x1], t_u0c1, e_u0c1)             # cat((u, x1), C) via K-stacked split weights
    y = conv([h], t_u0c2, e_u0c2)                 # (8, 64)

    # --- up block 1: UNetUpBlock(8, 4); exact 2x bilinear (align_corners=False) = 2 matmuls ---
    y = jnp.dot(uph[...], jnp.dot(y, upw[...], preferred_element_type=f32),
                preferred_element_type=f32)       # (16, 128): 8 ch @ 16x16
    u = conv([y], t_u1up, e_u1up)                 # (16, 64) : 4 ch
    h = conv([u, x0], t_u1c1, e_u1c1)             # cat((u, x0), C) via K-stacked split weights
    y = conv([h], t_u1c2, e_u1c2)                 # (16, 64)

    # --- output_layer: Conv2d(4, 1, 3x3, padding=1), bias only; Cout padded to 8 so the store
    #     is a lane-dense (16, 128) slab (channel 0 of every 8-lane block is the real logit) ---
    out = conv([y], t_out, e_out, relu_bn=False)  # (16, 128)
    o_ref[...] = out.reshape(o_ref.shape)


# ---------------------------------------------------------------------------
# Public forward: NCDHW in, NCHW out (like UNetClassify.forward)
# ---------------------------------------------------------------------------
def unet_classify_forward(x_ncdhw, consts):
    n, c, d, h, w = x_ncdhw.shape
    assert (c, d, h, w) == (4, 2, 16, 16), "packed weights are specialised to (4, 2, 16, 16)"
    assert len(consts) == 29

    # NCDHW -> row-slab (N, H, W*(D*C)); packed channel index = d*C + c matches the weights.
    x_slab = jnp.transpose(x_ncdhw.astype(jnp.float32), (0, 3, 4, 2, 1)).reshape(n, h, w * d * c)

    const_specs = [pl.BlockSpec(a.shape, lambda i, _nd=a.ndim: (0,) * _nd) for a in consts]
    out_slab = pl.pallas_call(
        _unet_kernel,
        out_shape=jax.ShapeDtypeStruct((n, h, w * 8), jnp.float32),
        grid=(n,),
        in_specs=[pl.BlockSpec((1, h, w * d * c), lambda i: (i, 0, 0))] + const_specs,
        out_specs=pl.BlockSpec((1, h, w * 8), lambda i: (i, 0, 0)),
        compiler_params=pltpu.CompilerParams(dimension_semantics=("parallel",)),
    )(x_slab, *consts)
    # lane-dense (N, H, W*8) slab -> channel 0 of each 8-lane block is the real logit.
    return out_slab.reshape(n, h, w, 8)[..., 0].reshape(n, 1, h, w)


if __name__ == "__main__":
    # PyTorch input convention: (N, C=4, D=2, H, W); D=2 so Conv3d's (2,7,7) kernel yields depth 1.
    x = jax.random.normal(jax.random.PRNGKey(0), (2, 4, 2, 16, 16), jnp.float32)
    params = init_params(layers=2, init_filters=4)
    consts = pack_params(params, height=16, width=16)
    out = jax.block_until_ready(unet_classify_forward(x, consts))
    assert out.shape == (2, 1, 16, 16), out.shape
    assert bool(jnp.all(jnp.isfinite(out)))
    print("KERNEL_OK")
</pallas_src>

<mosaic_0001>
module attributes {stable_mosaic.version = 11 : i64} {
  func.func @_unet_kernel(%arg0: i32, %arg1: memref<1x16x128xf32, #tpu.memory_space<vmem>>, %arg2: memref<8x16xf32, #tpu.memory_space<vmem>>, %arg3: memref<128x64xf32, #tpu.memory_space<vmem>>, %arg4: memref<128x64xf32, #tpu.memory_space<vmem>>, %arg5: memref<16x8xf32, #tpu.memory_space<vmem>>, %arg6: memref<64x128xf32, #tpu.memory_space<vmem>>, %arg7: memref<896x64xbf16, #tpu.memory_space<vmem>>, %arg8: memref<3x64xf32, #tpu.memory_space<vmem>>, %arg9: memref<192x128xbf16, #tpu.memory_space<vmem>>, %arg10: memref<3x128xf32, #tpu.memory_space<vmem>>, %arg11: memref<384x128xbf16, #tpu.memory_space<vmem>>, %arg12: memref<3x128xf32, #tpu.memory_space<vmem>>, %arg13: memref<192x128xbf16, #tpu.memory_space<vmem>>, %arg14: memref<3x128xf32, #tpu.memory_space<vmem>>, %arg15: memref<384x128xbf16, #tpu.memory_space<vmem>>, %arg16: memref<3x128xf32, #tpu.memory_space<vmem>>, %arg17: memref<384x64xbf16, #tpu.memory_space<vmem>>, %arg18: memref<3x64xf32, #tpu.memory_space<vmem>>, %arg19: memref<384x64xbf16, #tpu.memory_space<vmem>>, %arg20: memref<3x64xf32, #tpu.memory_space<vmem>>, %arg21: memref<192x64xbf16, #tpu.memory_space<vmem>>, %arg22: memref<3x64xf32, #tpu.memory_space<vmem>>, %arg23: memref<384x64xbf16, #tpu.memory_space<vmem>>, %arg24: memref<3x64xf32, #tpu.memory_space<vmem>>, %arg25: memref<384x64xbf16, #tpu.memory_space<vmem>>, %arg26: memref<3x64xf32, #tpu.memory_space<vmem>>, %arg27: memref<192x64xbf16, #tpu.memory_space<vmem>>, %arg28: memref<3x64xf32, #tpu.memory_space<vmem>>, %arg29: memref<192x128xbf16, #tpu.memory_space<vmem>>, %arg30: memref<3x128xf32, #tpu.memory_space<vmem>>, %arg31: memref<1x16x128xf32, #tpu.memory_space<vmem>>) attributes {dimension_semantics = [#tpu.dimension_semantics<parallel>], iteration_bounds = array<i64: 2>, scalar_prefetch = 0 : i64, scratch_operands = 0 : i64, tpu.core_type = #tpu.core_type<tc>, window_params = [{transform_indices = @transform_0, window_bounds = array<i64: 1, 16, 128>}, {pipeline_mode = #tpu.pipeline_mode<synchronous>, transform_indices = @transform_1, window_bounds = array<i64: 8, 16>}, {pipeline_mode = #tpu.pipeline_mode<synchronous>, transform_indices = @transform_2, window_bounds = array<i64: 128, 64>}, {pipeline_mode = #tpu.pipeline_mode<synchronous>, transform_indices = @transform_3, window_bounds = array<i64: 128, 64>}, {pipeline_mode = #tpu.pipeline_mode<synchronous>, transform_indices = @transform_4, window_bounds = array<i64: 16, 8>}, {pipeline_mode = #tpu.pipeline_mode<synchronous>, transform_indices = @transform_5, window_bounds = array<i64: 64, 128>}, {pipeline_mode = #tpu.pipeline_mode<synchronous>, transform_indices = @transform_6, window_bounds = array<i64: 896, 64>}, {pipeline_mode = #tpu.pipeline_mode<synchronous>, transform_indices = @transform_7, window_bounds = array<i64: 3, 64>}, {pipeline_mode = #tpu.pipeline_mode<synchronous>, transform_indices = @transform_8, window_bounds = array<i64: 192, 128>}, {pipeline_mode = #tpu.pipeline_mode<synchronous>, transform_indices = @transform_9, window_bounds = array<i64: 3, 128>}, {pipeline_mode = #tpu.pipeline_mode<synchronous>, transform_indices = @transform_10, window_bounds = array<i64: 384, 128>}, {pipeline_mode = #tpu.pipeline_mode<synchronous>, transform_indices = @transform_11, window_bounds = array<i64: 3, 128>}, {pipeline_mode = #tpu.pipeline_mode<synchronous>, transform_indices = @transform_12, window_bounds = array<i64: 192, 128>}, {pipeline_mode = #tpu.pipeline_mode<synchronous>, transform_indices = @transform_13, window_bounds = array<i64: 3, 128>}, {pipeline_mode = #tpu.pipeline_mode<synchronous>, transform_indices = @transform_14, window_bounds = array<i64: 384, 128>}, {pipeline_mode = #tpu.pipeline_mode<synchronous>, transform_indices = @transform_15, window_bounds = array<i64: 3, 128>}, {pipeline_mode = #tpu.pipeline_mode<synchronous>, transform_indices = @transform_16, window_bounds = array<i64: 384, 64>}, {pipeline_mode = #tpu.pipeline_mode<synchronous>, transform_indices = @transform_17, window_bounds = array<i64: 3, 64>}, {pipeline_mode = #tpu.pipeline_mode<synchronous>, transform_indices = @transform_18, window_bounds = array<i64: 384, 64>}, {pipeline_mode = #tpu.pipeline_mode<synchronous>, transform_indices = @transform_19, window_bounds = array<i64: 3, 64>}, {pipeline_mode = #tpu.pipeline_mode<synchronous>, transform_indices = @transform_20, window_bounds = array<i64: 192, 64>}, {pipeline_mode = #tpu.pipeline_mode<synchronous>, transform_indices = @transform_21, window_bounds = array<i64: 3, 64>}, {pipeline_mode = #tpu.pipeline_mode<synchronous>, transform_indices = @transform_22, window_bounds = array<i64: 384, 64>}, {pipeline_mode = #tpu.pipeline_mode<synchronous>, transform_indices = @transform_23, window_bounds = array<i64: 3, 64>}, {pipeline_mode = #tpu.pipeline_mode<synchronous>, transform_indices = @transform_24, window_bounds = array<i64: 384, 64>}, {pipeline_mode = #tpu.pipeline_mode<synchronous>, transform_indices = @transform_25, window_bounds = array<i64: 3, 64>}, {pipeline_mode = #tpu.pipeline_mode<synchronous>, transform_indices = @transform_26, window_bounds = array<i64: 192, 64>}, {pipeline_mode = #tpu.pipeline_mode<synchronous>, transform_indices = @transform_27, window_bounds = array<i64: 3, 64>}, {pipeline_mode = #tpu.pipeline_mode<synchronous>, transform_indices = @transform_28, window_bounds = array<i64: 192, 128>}, {pipeline_mode = #tpu.pipeline_mode<synchronous>, transform_indices = @transform_29, window_bounds = array<i64: 3, 128>}, {transform_indices = @transform_30, window_bounds = array<i64: 1, 16, 128>}]} {
    %c0 = arith.constant 0 : index
    %c0_0 = arith.constant 0 : index
    %c0_1 = arith.constant 0 : index
    %0 = vector.load %arg1[%c0, %c0_0, %c0_1] : memref<1x16x128xf32, #tpu.memory_space<vmem>>, vector<1x16x128xf32>
    %1 = vector.shape_cast %0 : vector<1x16x128xf32> to vector<16x128xf32>
    %cst = arith.constant 0.000000e+00 : f32
    %2 = vector.broadcast %cst : f32 to vector<3x128xf32>
    %3 = tpu.concatenate %2, %1, %2 in 0 : vector<3x128xf32>, vector<16x128xf32>, vector<3x128xf32> -> vector<22x128xf32>
    %4 = vector.extract_strided_slice %3 {offsets = [0, 0], sizes = [16, 128], strides = [1, 1]} : vector<22x128xf32> to vector<16x128xf32>
    %5 = vector.extract_strided_slice %3 {offsets = [1, 0], sizes = [16, 128], strides = [1, 1]} : vector<22x128xf32> to vector<16x128xf32>
    %6 = vector.extract_strided_slice %3 {offsets = [2, 0], sizes = [16, 128], strides = [1, 1]} : vector<22x128xf32> to vector<16x128xf32>
    %7 = vector.extract_strided_slice %3 {offsets = [4, 0], sizes = [16, 128], strides = [1, 1]} : vector<22x128xf32> to vector<16x128xf32>
    %8 = vector.extract_strided_slice %3 {offsets = [5, 0], sizes = [16, 128], strides = [1, 1]} : vector<22x128xf32> to vector<16x128xf32>
    %9 = vector.extract_strided_slice %3 {offsets = [6, 0], sizes = [16, 128], strides = [1, 1]} : vector<22x128xf32> to vector<16x128xf32>
    %10 = tpu.concatenate %4, %5, %6, %1, %7, %8, %9 in 1 : vector<16x128xf32>, vector<16x128xf32>, vector<16x128xf32>, vector<16x128xf32>, vector<16x128xf32>, vector<16x128xf32>, vector<16x128xf32> -> vector<16x896xf32>
    %11 = arith.truncf %10 : vector<16x896xf32> to vector<16x896xbf16>
    %c0_2 = arith.constant 0 : index
    %c0_3 = arith.constant 0 : index
    %12 = vector.load %arg7[%c0_2, %c0_3] : memref<896x64xbf16, #tpu.memory_space<vmem>>, vector<896x64xbf16>
    %cst_4 = arith.constant dense<0.000000e+00> : vector<16x64xf32>
    %13 = tpu.matmul %11, %12, %cst_4 {dimension_numbers = #tpu.dot_dimension_numbers<[1], [0], [0], [1], [0, 0, 1, 1], [], []>} : vector<16x896xbf16>, vector<896x64xbf16>, vector<16x64xf32> -> vector<16x64xf32>
    %c0_5 = arith.constant 0 : index
    %c0_6 = arith.constant 0 : index
    %14 = vector.load %arg8[%c0_5, %c0_6] : memref<3x64xf32, #tpu.memory_space<vmem>>, vector<1x64xf32>
    %15 = vector.broadcast %14 : vector<1x64xf32> to vector<16x64xf32>
    %16 = arith.addf %13, %15 : vector<16x64xf32>
    %cst_7 = arith.constant 0.000000e+00 : f32
    %17 = vector.broadcast %cst_7 : f32 to vector<16x64xf32>
    %18 = arith.maximumf %16, %17 : vector<16x64xf32>
    %c1 = arith.constant 1 : index
    %c0_8 = arith.constant 0 : index
    %19 = vector.load %arg8[%c1, %c0_8] : memref<3x64xf32, #tpu.memory_space<vmem>>, vector<1x64xf32>
    %20 = vector.broadcast %19 : vector<1x64xf32> to vector<16x64xf32>
    %21 = arith.mulf %18, %20 : vector<16x64xf32>
    %c2 = arith.constant 2 : index
    %c0_9 = arith.constant 0 : index
    %22 = vector.load %arg8[%c2, %c0_9] : memref<3x64xf32, #tpu.memory_space<vmem>>, vector<1x64xf32>
    %23 = vector.broadcast %22 : vector<1x64xf32> to vector<16x64xf32>
    %24 = arith.addf %21, %23 : vector<16x64xf32>
    %cst_10 = arith.constant 0.000000e+00 : f32
    %25 = vector.broadcast %cst_10 : f32 to vector<1x64xf32>
    %26 = tpu.concatenate %25, %24, %25 in 0 : vector<1x64xf32>, vector<16x64xf32>, vector<1x64xf32> -> vector<18x64xf32>
    %27 = vector.extract_strided_slice %26 {offsets = [0, 0], sizes = [16, 64], strides = [1, 1]} : vector<18x64xf32> to vector<16x64xf32>
    %28 = vector.extract_strided_slice %26 {offsets = [2, 0], sizes = [16, 64], strides = [1, 1]} : vector<18x64xf32> to vector<16x64xf32>
    %29 = tpu.concatenate %27, %24, %28 in 1 : vector<16x64xf32>, vector<16x64xf32>, vector<16x64xf32> -> vector<16x192xf32>
    %30 = arith.truncf %29 : vector<16x192xf32> to vector<16x192xbf16>
    %c0_11 = arith.constant 0 : index
    %c0_12 = arith.constant 0 : index
    %31 = vector.load %arg9[%c0_11, %c0_12] : memref<192x128xbf16, #tpu.memory_space<vmem>>, vector<192x128xbf16>
    %cst_13 = arith.constant dense<0.000000e+00> : vector<16x128xf32>
    %32 = tpu.matmul %30, %31, %cst_13 {dimension_numbers = #tpu.dot_dimension_numbers<[1], [0], [0], [1], [0, 0, 1, 1], [], []>} : vector<16x192xbf16>, vector<192x128xbf16>, vector<16x128xf32> -> vector<16x128xf32>
    %c0_14 = arith.constant 0 : index
    %c0_15 = arith.constant 0 : index
    %33 = vector.load %arg10[%c0_14, %c0_15] : memref<3x128xf32, #tpu.memory_space<vmem>>, vector<1x128xf32>
    %34 = vector.broadcast %33 : vector<1x128xf32> to vector<16x128xf32>
    %35 = arith.addf %32, %34 : vector<16x128xf32>
    %cst_16 = arith.constant 0.000000e+00 : f32
    %36 = vector.broadcast %cst_16 : f32 to vector<16x128xf32>
    %37 = arith.maximumf %35, %36 : vector<16x128xf32>
    %c1_17 = arith.constant 1 : index
    %c0_18 = arith.constant 0 : index
    %38 = vector.load %arg10[%c1_17, %c0_18] : memref<3x128xf32, #tpu.memory_space<vmem>>, vector<1x128xf32>
    %39 = vector.broadcast %38 : vector<1x128xf32> to vector<16x128xf32>
    %40 = arith.mulf %37, %39 : vector<16x128xf32>
    %c2_19 = arith.constant 2 : index
    %c0_20 = arith.constant 0 : index
    %41 = vector.load %arg10[%c2_19, %c0_20] : memref<3x128xf32, #tpu.memory_space<vmem>>, vector<1x128xf32>
    %42 = vector.broadcast %41 : vector<1x128xf32> to vector<16x128xf32>
    %43 = arith.addf %40, %42 : vector<16x128xf32>
    %cst_21 = arith.constant 0.000000e+00 : f32
    %44 = vector.broadcast %cst_21 : f32 to vector<1x128xf32>
    %45 = tpu.concatenate %44, %43, %44 in 0 : vector<1x128xf32>, vector<16x128xf32>, vector<1x128xf32> -> vector<18x128xf32>
    %46 = vector.extract_strided_slice %45 {offsets = [0, 0], sizes = [16, 128], strides = [1, 1]} : vector<18x128xf32> to vector<16x128xf32>
    %47 = vector.extract_strided_slice %45 {offsets = [2, 0], sizes = [16, 128], strides = [1, 1]} : vector<18x128xf32> to vector<16x128xf32>
    %48 = tpu.concatenate %46, %43, %47 in 1 : vector<16x128xf32>, vector<16x128xf32>, vector<16x128xf32> -> vector<16x384xf32>
    %49 = arith.truncf %48 : vector<16x384xf32> to vector<16x384xbf16>
    %c0_22 = arith.constant 0 : index
    %c0_23 = arith.constant 0 : index
    %50 = vector.load %arg11[%c0_22, %c0_23] : memref<384x128xbf16, #tpu.memory_space<vmem>>, vector<384x128xbf16>
    %cst_24 = arith.constant dense<0.000000e+00> : vector<16x128xf32>
    %51 = tpu.matmul %49, %50, %cst_24 {dimension_numbers = #tpu.dot_dimension_numbers<[1], [0], [0], [1], [0, 0, 1, 1], [], []>} : vector<16x384xbf16>, vector<384x128xbf16>, vector<16x128xf32> -> vector<16x128xf32>
    %c0_25 = arith.constant 0 : index
    %c0_26 = arith.constant 0 : index
    %52 = vector.load %arg12[%c0_25, %c0_26] : memref<3x128xf32, #tpu.memory_space<vmem>>, vector<1x128xf32>
    %53 = vector.broadcast %52 : vector<1x128xf32> to vector<16x128xf32>
    %54 = arith.addf %51, %53 : vector<16x128xf32>
    %cst_27 = arith.constant 0.000000e+00 : f32
    %55 = vector.broadcast %cst_27 : f32 to vector<16x128xf32>
    %56 = arith.maximumf %54, %55 : vector<16x128xf32>
    %c1_28 = arith.constant 1 : index
    %c0_29 = arith.constant 0 : index
    %57 = vector.load %arg12[%c1_28, %c0_29] : memref<3x128xf32, #tpu.memory_space<vmem>>, vector<1x128xf32>
    %58 = vector.broadcast %57 : vector<1x128xf32> to vector<16x128xf32>
    %59 = arith.mulf %56, %58 : vector<16x128xf32>
    %c2_30 = arith.constant 2 : index
    %c0_31 = arith.constant 0 : index
    %60 = vector.load %arg12[%c2_30, %c0_31] : memref<3x128xf32, #tpu.memory_space<vmem>>, vector<1x128xf32>
    %61 = vector.broadcast %60 : vector<1x128xf32> to vector<16x128xf32>
    %62 = arith.addf %59, %61 : vector<16x128xf32>
    %63 = vector.extract_strided_slice %62 {offsets = [1, 0], sizes = [15, 128], strides = [1, 1]} : vector<16x128xf32> to vector<15x128xf32>
    %cst_32 = arith.constant 0.000000e+00 : f32
    %64 = vector.broadcast %cst_32 : f32 to vector<1x128xf32>
    %65 = tpu.concatenate %63, %64 in 0 : vector<15x128xf32>, vector<1x128xf32> -> vector<16x128xf32>
    %66 = arith.maximumf %62, %65 : vector<16x128xf32>
    %c0_33 = arith.constant 0 : index
    %c0_34 = arith.constant 0 : index
    %67 = vector.load %arg2[%c0_33, %c0_34] : memref<8x16xf32, #tpu.memory_space<vmem>>, vector<8x16xf32>
    %cst_35 = arith.constant dense<0.000000e+00> : vector<8x128xf32>
    %68 = tpu.matmul %67, %66, %cst_35 {dimension_numbers = #tpu.dot_dimension_numbers<[1], [0], [0], [1], [0, 0, 1, 1], [], []>} : vector<8x16xf32>, vector<16x128xf32>, vector<8x128xf32> -> vector<8x128xf32>
    %c0_36 = arith.constant 0 : index
    %c0_37 = arith.constant 0 : index
    %69 = vector.load %arg3[%c0_36, %c0_37] : memref<128x64xf32, #tpu.memory_space<vmem>>, vector<128x64xf32>
    %cst_38 = arith.constant dense<0.000000e+00> : vector<8x64xf32>
    %70 = tpu.matmul %68, %69, %cst_38 {dimension_numbers = #tpu.dot_dimension_numbers<[1], [0], [0], [1], [0, 0, 1, 1], [], []>} : vector<8x128xf32>, vector<128x64xf32>, vector<8x64xf32> -> vector<8x64xf32>
    %c0_39 = arith.constant 0 : index
    %c0_40 = arith.constant 0 : index
    %71 = vector.load %arg4[%c0_39, %c0_40] : memref<128x64xf32, #tpu.memory_space<vmem>>, vector<128x64xf32>
    %cst_41 = arith.constant dense<0.000000e+00> : vector<8x64xf32>
    %72 = tpu.matmul %68, %71, %cst_41 {dimension_numbers = #tpu.dot_dimension_numbers<[1], [0], [0], [1], [0, 0, 1, 1], [], []>} : vector<8x128xf32>, vector<128x64xf32>, vector<8x64xf32> -> vector<8x64xf32>
    %73 = arith.maximumf %70, %72 : vector<8x64xf32>
    %cst_42 = arith.constant 0.000000e+00 : f32
    %74 = vector.broadcast %cst_42 : f32 to vector<1x64xf32>
    %75 = tpu.concatenate %74, %73, %74 in 0 : vector<1x64xf32>, vector<8x64xf32>, vector<1x64xf32> -> vector<10x64xf32>
    %76 = vector.extract_strided_slice %75 {offsets = [0, 0], sizes = [8, 64], strides = [1, 1]} : vector<10x64xf32> to vector<8x64xf32>
    %77 = vector.extract_strided_slice %75 {offsets = [2, 0], sizes = [8, 64], strides = [1, 1]} : vector<10x64xf32> to vector<8x64xf32>
    %78 = tpu.concatenate %76, %73, %77 in 1 : vector<8x64xf32>, vector<8x64xf32>, vector<8x64xf32> -> vector<8x192xf32>
    %79 = arith.truncf %78 : vector<8x192xf32> to vector<8x192xbf16>
    %c0_43 = arith.constant 0 : index
    %c0_44 = arith.constant 0 : index
    %80 = vector.load %arg13[%c0_43, %c0_44] : memref<192x128xbf16, #tpu.memory_space<vmem>>, vector<192x128xbf16>
    %cst_45 = arith.constant dense<0.000000e+00> : vector<8x128xf32>
    %81 = tpu.matmul %79, %80, %cst_45 {dimension_numbers = #tpu.dot_dimension_numbers<[1], [0], [0], [1], [0, 0, 1, 1], [], []>} : vector<8x192xbf16>, vector<192x128xbf16>, vector<8x128xf32> -> vector<8x128xf32>
    %c0_46 = arith.constant 0 : index
    %c0_47 = arith.constant 0 : index
    %82 = vector.load %arg14[%c0_46, %c0_47] : memref<3x128xf32, #tpu.memory_space<vmem>>, vector<1x128xf32>
    %83 = vector.broadcast %82 : vector<1x128xf32> to vector<8x128xf32>
    %84 = arith.addf %81, %83 : vector<8x128xf32>
    %cst_48 = arith.constant 0.000000e+00 : f32
    %85 = vector.broadcast %cst_48 : f32 to vector<8x128xf32>
    %86 = arith.maximumf %84, %85 : vector<8x128xf32>
    %c1_49 = arith.constant 1 : index
    %c0_50 = arith.constant 0 : index
    %87 = vector.load %arg14[%c1_49, %c0_50] : memref<3x128xf32, #tpu.memory_space<vmem>>, vector<1x128xf32>
    %88 = vector.broadcast %87 : vector<1x128xf32> to vector<8x128xf32>
    %89 = arith.mulf %86, %88 : vector<8x128xf32>
    %c2_51 = arith.constant 2 : index
    %c0_52 = arith.constant 0 : index
    %90 = vector.load %arg14[%c2_51, %c0_52] : memref<3x128xf32, #tpu.memory_space<vmem>>, vector<1x128xf32>
    %91 = vector.broadcast %90 : vector<1x128xf32> to vector<8x128xf32>
    %92 = arith.addf %89, %91 : vector<8x128xf32>
    %cst_53 = arith.constant 0.000000e+00 : f32
    %93 = vector.broadcast %cst_53 : f32 to vector<1x128xf32>
    %94 = tpu.concatenate %93, %92, %93 in 0 : vector<1x128xf32>, vector<8x128xf32>, vector<1x128xf32> -> vector<10x128xf32>
    %95 = vector.extract_strided_slice %94 {offsets = [0, 0], sizes = [8, 128], strides = [1, 1]} : vector<10x128xf32> to vector<8x128xf32>
    %96 = vector.extract_strided_slice %94 {offsets = [2, 0], sizes = [8, 128], strides = [1, 1]} : vector<10x128xf32> to vector<8x128xf32>
    %97 = tpu.concatenate %95, %92, %96 in 1 : vector<8x128xf32>, vector<8x128xf32>, vector<8x128xf32> -> vector<8x384xf32>
    %98 = arith.truncf %97 : vector<8x384xf32> to vector<8x384xbf16>
    %c0_54 = arith.constant 0 : index
    %c0_55 = arith.constant 0 : index
    %99 = vector.load %arg15[%c0_54, %c0_55] : memref<384x128xbf16, #tpu.memory_space<vmem>>, vector<384x128xbf16>
    %cst_56 = arith.constant dense<0.000000e+00> : vector<8x128xf32>
    %100 = tpu.matmul %98, %99, %cst_56 {dimension_numbers = #tpu.dot_dimension_numbers<[1], [0], [0], [1], [0, 0, 1, 1], [], []>} : vector<8x384xbf16>, vector<384x128xbf16>, vector<8x128xf32> -> vector<8x128xf32>
    %c0_57 = arith.constant 0 : index
    %c0_58 = arith.constant 0 : index
    %101 = vector.load %arg16[%c0_57, %c0_58] : memref<3x128xf32, #tpu.memory_space<vmem>>, vector<1x128xf32>
    %102 = vector.broadcast %101 : vector<1x128xf32> to vector<8x128xf32>
    %103 = arith.addf %100, %102 : vector<8x128xf32>
    %cst_59 = arith.constant 0.000000e+00 : f32
    %104 = vector.broadcast %cst_59 : f32 to vector<8x128xf32>
    %105 = arith.maximumf %103, %104 : vector<8x128xf32>
    %c1_60 = arith.constant 1 : index
    %c0_61 = arith.constant 0 : index
    %106 = vector.load %arg16[%c1_60, %c0_61] : memref<3x128xf32, #tpu.memory_space<vmem>>, vector<1x128xf32>
    %107 = vector.broadcast %106 : vector<1x128xf32> to vector<8x128xf32>
    %108 = arith.mulf %105, %107 : vector<8x128xf32>
    %c2_62 = arith.constant 2 : index
    %c0_63 = arith.constant 0 : index
    %109 = vector.load %arg16[%c2_62, %c0_63] : memref<3x128xf32, #tpu.memory_space<vmem>>, vector<1x128xf32>
    %110 = vector.broadcast %109 : vector<1x128xf32> to vector<8x128xf32>
    %111 = arith.addf %108, %110 : vector<8x128xf32>
    %cst_64 = arith.constant 0.000000e+00 : f32
    %112 = vector.broadcast %cst_64 : f32 to vector<1x128xf32>
    %113 = tpu.concatenate %112, %111, %112 in 0 : vector<1x128xf32>, vector<8x128xf32>, vector<1x128xf32> -> vector<10x128xf32>
    %114 = vector.extract_strided_slice %113 {offsets = [0, 0], sizes = [8, 128], strides = [1, 1]} : vector<10x128xf32> to vector<8x128xf32>
    %115 = vector.extract_strided_slice %113 {offsets = [2, 0], sizes = [8, 128], strides = [1, 1]} : vector<10x128xf32> to vector<8x128xf32>
    %116 = tpu.concatenate %114, %111, %115 in 1 : vector<8x128xf32>, vector<8x128xf32>, vector<8x128xf32> -> vector<8x384xf32>
    %117 = arith.truncf %116 : vector<8x384xf32> to vector<8x384xbf16>
    %c0_65 = arith.constant 0 : index
    %c0_66 = arith.constant 0 : index
    %118 = vector.load %arg17[%c0_65, %c0_66] : memref<384x64xbf16, #tpu.memory_space<vmem>>, vector<384x64xbf16>
    %cst_67 = arith.constant dense<0.000000e+00> : vector<8x64xf32>
    %119 = tpu.matmul %117, %118, %cst_67 {dimension_numbers = #tpu.dot_dimension_numbers<[1], [0], [0], [1], [0, 0, 1, 1], [], []>} : vector<8x384xbf16>, vector<384x64xbf16>, vector<8x64xf32> -> vector<8x64xf32>
    %c0_68 = arith.constant 0 : index
    %c0_69 = arith.constant 0 : index
    %120 = vector.load %arg18[%c0_68, %c0_69] : memref<3x64xf32, #tpu.memory_space<vmem>>, vector<1x64xf32>
    %121 = vector.broadcast %120 : vector<1x64xf32> to vector<8x64xf32>
    %122 = arith.addf %119, %121 : vector<8x64xf32>
    %cst_70 = arith.constant 0.000000e+00 : f32
    %123 = vector.broadcast %cst_70 : f32 to vector<8x64xf32>
    %124 = arith.maximumf %122, %123 : vector<8x64xf32>
    %c1_71 = arith.constant 1 : index
    %c0_72 = arith.constant 0 : index
    %125 = vector.load %arg18[%c1_71, %c0_72] : memref<3x64xf32, #tpu.memory_space<vmem>>, vector<1x64xf32>
    %126 = vector.broadcast %125 : vector<1x64xf32> to vector<8x64xf32>
    %127 = arith.mulf %124, %126 : vector<8x64xf32>
    %c2_73 = arith.constant 2 : index
    %c0_74 = arith.constant 0 : index
    %128 = vector.load %arg18[%c2_73, %c0_74] : memref<3x64xf32, #tpu.memory_space<vmem>>, vector<1x64xf32>
    %129 = vector.broadcast %128 : vector<1x64xf32> to vector<8x64xf32>
    %130 = arith.addf %127, %129 : vector<8x64xf32>
    %cst_75 = arith.constant 0.000000e+00 : f32
    %131 = vector.broadcast %cst_75 : f32 to vector<1x64xf32>
    %132 = tpu.concatenate %131, %130, %131 in 0 : vector<1x64xf32>, vector<8x64xf32>, vector<1x64xf32> -> vector<10x64xf32>
    %133 = vector.extract_strided_slice %132 {offsets = [0, 0], sizes = [8, 64], strides = [1, 1]} : vector<10x64xf32> to vector<8x64xf32>
    %134 = vector.extract_strided_slice %132 {offsets = [2, 0], sizes = [8, 64], strides = [1, 1]} : vector<10x64xf32> to vector<8x64xf32>
    %cst_76 = arith.constant 0.000000e+00 : f32
    %135 = vector.broadcast %cst_76 : f32 to vector<1x64xf32>
    %136 = tpu.concatenate %135, %73, %135 in 0 : vector<1x64xf32>, vector<8x64xf32>, vector<1x64xf32> -> vector<10x64xf32>
    %137 = vector.extract_strided_slice %136 {offsets = [0, 0], sizes = [8, 64], strides = [1, 1]} : vector<10x64xf32> to vector<8x64xf32>
    %138 = vector.extract_strided_slice %136 {offsets = [2, 0], sizes = [8, 64], strides = [1, 1]} : vector<10x64xf32> to vector<8x64xf32>
    %139 = tpu.concatenate %133, %130, %134, %137, %73, %138 in 1 : vector<8x64xf32>, vector<8x64xf32>, vector<8x64xf32>, vector<8x64xf32>, vector<8x64xf32>, vector<8x64xf32> -> vector<8x384xf32>
    %140 = arith.truncf %139 : vector<8x384xf32> to vector<8x384xbf16>
    %c0_77 = arith.constant 0 : index
    %c0_78 = arith.constant 0 : index
    %141 = vector.load %arg19[%c0_77, %c0_78] : memref<384x64xbf16, #tpu.memory_space<vmem>>, vector<384x64xbf16>
    %cst_79 = arith.constant dense<0.000000e+00> : vector<8x64xf32>
    %142 = tpu.matmul %140, %141, %cst_79 {dimension_numbers = #tpu.dot_dimension_numbers<[1], [0], [0], [1], [0, 0, 1, 1], [], []>} : vector<8x384xbf16>, vector<384x64xbf16>, vector<8x64xf32> -> vector<8x64xf32>
    %c0_80 = arith.constant 0 : index
    %c0_81 = arith.constant 0 : index
    %143 = vector.load %arg20[%c0_80, %c0_81] : memref<3x64xf32, #tpu.memory_space<vmem>>, vector<1x64xf32>
    %144 = vector.broadcast %143 : vector<1x64xf32> to vector<8x64xf32>
    %145 = arith.addf %142, %144 : vector<8x64xf32>
    %cst_82 = arith.constant 0.000000e+00 : f32
    %146 = vector.broadcast %cst_82 : f32 to vector<8x64xf32>
    %147 = arith.maximumf %145, %146 : vector<8x64xf32>
    %c1_83 = arith.constant 1 : index
    %c0_84 = arith.constant 0 : index
    %148 = vector.load %arg20[%c1_83, %c0_84] : memref<3x64xf32, #tpu.memory_space<vmem>>, vector<1x64xf32>
    %149 = vector.broadcast %148 : vector<1x64xf32> to vector<8x64xf32>
    %150 = arith.mulf %147, %149 : vector<8x64xf32>
    %c2_85 = arith.constant 2 : index
    %c0_86 = arith.constant 0 : index
    %151 = vector.load %arg20[%c2_85, %c0_86] : memref<3x64xf32, #tpu.memory_space<vmem>>, vector<1x64xf32>
    %152 = vector.broadcast %151 : vector<1x64xf32> to vector<8x64xf32>
    %153 = arith.addf %150, %152 : vector<8x64xf32>
    %cst_87 = arith.constant 0.000000e+00 : f32
    %154 = vector.broadcast %cst_87 : f32 to vector<1x64xf32>
    %155 = tpu.concatenate %154, %153, %154 in 0 : vector<1x64xf32>, vector<8x64xf32>, vector<1x64xf32> -> vector<10x64xf32>
    %156 = vector.extract_strided_slice %155 {offsets = [0, 0], sizes = [8, 64], strides = [1, 1]} : vector<10x64xf32> to vector<8x64xf32>
    %157 = vector.extract_strided_slice %155 {offsets = [2, 0], sizes = [8, 64], strides = [1, 1]} : vector<10x64xf32> to vector<8x64xf32>
    %158 = tpu.concatenate %156, %153, %157 in 1 : vector<8x64xf32>, vector<8x64xf32>, vector<8x64xf32> -> vector<8x192xf32>
    %159 = arith.truncf %158 : vector<8x192xf32> to vector<8x192xbf16>
    %c0_88 = arith.constant 0 : index
    %c0_89 = arith.constant 0 : index
    %160 = vector.load %arg21[%c0_88, %c0_89] : memref<192x64xbf16, #tpu.memory_space<vmem>>, vector<192x64xbf16>
    %cst_90 = arith.constant dense<0.000000e+00> : vector<8x64xf32>
    %161 = tpu.matmul %159, %160, %cst_90 {dimension_numbers = #tpu.dot_dimension_numbers<[1], [0], [0], [1], [0, 0, 1, 1], [], []>} : vector<8x192xbf16>, vector<192x64xbf16>, vector<8x64xf32> -> vector<8x64xf32>
    %c0_91 = arith.constant 0 : index
    %c0_92 = arith.constant 0 : index
    %162 = vector.load %arg22[%c0_91, %c0_92] : memref<3x64xf32, #tpu.memory_space<vmem>>, vector<1x64xf32>
    %163 = vector.broadcast %162 : vector<1x64xf32> to vector<8x64xf32>
    %164 = arith.addf %161, %163 : vector<8x64xf32>
    %cst_93 = arith.constant 0.000000e+00 : f32
    %165 = vector.broadcast %cst_93 : f32 to vector<8x64xf32>
    %166 = arith.maximumf %164, %165 : vector<8x64xf32>
    %c1_94 = arith.constant 1 : index
    %c0_95 = arith.constant 0 : index
    %167 = vector.load %arg22[%c1_94, %c0_95] : memref<3x64xf32, #tpu.memory_space<vmem>>, vector<1x64xf32>
    %168 = vector.broadcast %167 : vector<1x64xf32> to vector<8x64xf32>
    %169 = arith.mulf %166, %168 : vector<8x64xf32>
    %c2_96 = arith.constant 2 : index
    %c0_97 = arith.constant 0 : index
    %170 = vector.load %arg22[%c2_96, %c0_97] : memref<3x64xf32, #tpu.memory_space<vmem>>, vector<1x64xf32>
    %171 = vector.broadcast %170 : vector<1x64xf32> to vector<8x64xf32>
    %172 = arith.addf %169, %171 : vector<8x64xf32>
    %c0_98 = arith.constant 0 : index
    %c0_99 = arith.constant 0 : index
    %173 = vector.load %arg5[%c0_98, %c0_99] : memref<16x8xf32, #tpu.memory_space<vmem>>, vector<16x8xf32>
    %c0_100 = arith.constant 0 : index
    %c0_101 = arith.constant 0 : index
    %174 = vector.load %arg6[%c0_100, %c0_101] : memref<64x128xf32, #tpu.memory_space<vmem>>, vector<64x128xf32>
    %cst_102 = arith.constant dense<0.000000e+00> : vector<8x128xf32>
    %175 = tpu.matmul %172, %174, %cst_102 {dimension_numbers = #tpu.dot_dimension_numbers<[1], [0], [0], [1], [0, 0, 1, 1], [], []>} : vector<8x64xf32>, vector<64x128xf32>, vector<8x128xf32> -> vector<8x128xf32>
    %cst_103 = arith.constant dense<0.000000e+00> : vector<16x128xf32>
    %176 = tpu.matmul %173, %175, %cst_103 {dimension_numbers = #tpu.dot_dimension_numbers<[1], [0], [0], [1], [0, 0, 1, 1], [], []>} : vector<16x8xf32>, vector<8x128xf32>, vector<16x128xf32> -> vector<16x128xf32>
    %cst_104 = arith.constant 0.000000e+00 : f32
    %177 = vector.broadcast %cst_104 : f32 to vector<1x128xf32>
    %178 = tpu.concatenate %177, %176, %177 in 0 : vector<1x128xf32>, vector<16x128xf32>, vector<1x128xf32> -> vector<18x128xf32>
    %179 = vector.extract_strided_slice %178 {offsets = [0, 0], sizes = [16, 128], strides = [1, 1]} : vector<18x128xf32> to vector<16x128xf32>
    %180 = vector.extract_strided_slice %178 {offsets = [2, 0], sizes = [16, 128], strides = [1, 1]} : vector<18x128xf32> to vector<16x128xf32>
    %181 = tpu.concatenate %179, %176, %180 in 1 : vector<16x128xf32>, vector<16x128xf32>, vector<16x128xf32> -> vector<16x384xf32>
    %182 = arith.truncf %181 : vector<16x384xf32> to vector<16x384xbf16>
    %c0_105 = arith.constant 0 : index
    %c0_106 = arith.constant 0 : index
    %183 = vector.load %arg23[%c0_105, %c0_106] : memref<384x64xbf16, #tpu.memory_space<vmem>>, vector<384x64xbf16>
    %cst_107 = arith.constant dense<0.000000e+00> : vector<16x64xf32>
    %184 = tpu.matmul %182, %183, %cst_107 {dimension_numbers = #tpu.dot_dimension_numbers<[1], [0], [0], [1], [0, 0, 1, 1], [], []>} : vector<16x384xbf16>, vector<384x64xbf16>, vector<16x64xf32> -> vector<16x64xf32>
    %c0_108 = arith.constant 0 : index
    %c0_109 = arith.constant 0 : index
    %185 = vector.load %arg24[%c0_108, %c0_109] : memref<3x64xf32, #tpu.memory_space<vmem>>, vector<1x64xf32>
    %186 = vector.broadcast %185 : vector<1x64xf32> to vector<16x64xf32>
    %187 = arith.addf %184, %186 : vector<16x64xf32>
    %cst_110 = arith.constant 0.000000e+00 : f32
    %188 = vector.broadcast %cst_110 : f32 to vector<16x64xf32>
    %189 = arith.maximumf %187, %188 : vector<16x64xf32>
    %c1_111 = arith.constant 1 : index
    %c0_112 = arith.constant 0 : index
    %190 = vector.load %arg24[%c1_111, %c0_112] : memref<3x64xf32, #tpu.memory_space<vmem>>, vector<1x64xf32>
    %191 = vector.broadcast %190 : vector<1x64xf32> to vector<16x64xf32>
    %192 = arith.mulf %189, %191 : vector<16x64xf32>
    %c2_113 = arith.constant 2 : index
    %c0_114 = arith.constant 0 : index
    %193 = vector.load %arg24[%c2_113, %c0_114] : memref<3x64xf32, #tpu.memory_space<vmem>>, vector<1x64xf32>
    %194 = vector.broadcast %193 : vector<1x64xf32> to vector<16x64xf32>
    %195 = arith.addf %192, %194 : vector<16x64xf32>
    %cst_115 = arith.constant 0.000000e+00 : f32
    %196 = vector.broadcast %cst_115 : f32 to vector<1x64xf32>
    %197 = tpu.concatenate %196, %195, %196 in 0 : vector<1x64xf32>, vector<16x64xf32>, vector<1x64xf32> -> vector<18x64xf32>
    %198 = vector.extract_strided_slice %197 {offsets = [0, 0], sizes = [16, 64], strides = [1, 1]} : vector<18x64xf32> to vector<16x64xf32>
    %199 = vector.extract_strided_slice %197 {offsets = [2, 0], sizes = [16, 64], strides = [1, 1]} : vector<18x64xf32> to vector<16x64xf32>
    %cst_116 = arith.constant 0.000000e+00 : f32
    %200 = vector.broadcast %cst_116 : f32 to vector<1x64xf32>
    %201 = tpu.concatenate %200, %24, %200 in 0 : vector<1x64xf32>, vector<16x64xf32>, vector<1x64xf32> -> vector<18x64xf32>
    %202 = vector.extract_strided_slice %201 {offsets = [0, 0], sizes = [16, 64], strides = [1, 1]} : vector<18x64xf32> to vector<16x64xf32>
    %203 = vector.extract_strided_slice %201 {offsets = [2, 0], sizes = [16, 64], strides = [1, 1]} : vector<18x64xf32> to vector<16x64xf32>
    %204 = tpu.concatenate %198, %195, %199, %202, %24, %203 in 1 : vector<16x64xf32>, vector<16x64xf32>, vector<16x64xf32>, vector<16x64xf32>, vector<16x64xf32>, vector<16x64xf32> -> vector<16x384xf32>
    %205 = arith.truncf %204 : vector<16x384xf32> to vector<16x384xbf16>
    %c0_117 = arith.constant 0 : index
    %c0_118 = arith.constant 0 : index
    %206 = vector.load %arg25[%c0_117, %c0_118] : memref<384x64xbf16, #tpu.memory_space<vmem>>, vector<384x64xbf16>
    %cst_119 = arith.constant dense<0.000000e+00> : vector<16x64xf32>
    %207 = tpu.matmul %205, %206, %cst_119 {dimension_numbers = #tpu.dot_dimension_numbers<[1], [0], [0], [1], [0, 0, 1, 1], [], []>} : vector<16x384xbf16>, vector<384x64xbf16>, vector<16x64xf32> -> vector<16x64xf32>
    %c0_120 = arith.constant 0 : index
    %c0_121 = arith.constant 0 : index
    %208 = vector.load %arg26[%c0_120, %c0_121] : memref<3x64xf32, #tpu.memory_space<vmem>>, vector<1x64xf32>
    %209 = vector.broadcast %208 : vector<1x64xf32> to vector<16x64xf32>
    %210 = arith.addf %207, %209 : vector<16x64xf32>
    %cst_122 = arith.constant 0.000000e+00 : f32
    %211 = vector.broadcast %cst_122 : f32 to vector<16x64xf32>
    %212 = arith.maximumf %210, %211 : vector<16x64xf32>
    %c1_123 = arith.constant 1 : index
    %c0_124 = arith.constant 0 : index
    %213 = vector.load %arg26[%c1_123, %c0_124] : memref<3x64xf32, #tpu.memory_space<vmem>>, vector<1x64xf32>
    %214 = vector.broadcast %213 : vector<1x64xf32> to vector<16x64xf32>
    %215 = arith.mulf %212, %214 : vector<16x64xf32>
    %c2_125 = arith.constant 2 : index
    %c0_126 = arith.constant 0 : index
    %216 = vector.load %arg26[%c2_125, %c0_126] : memref<3x64xf32, #tpu.memory_space<vmem>>, vector<1x64xf32>
    %217 = vector.broadcast %216 : vector<1x64xf32> to vector<16x64xf32>
    %218 = arith.addf %215, %217 : vector<16x64xf32>
    %cst_127 = arith.constant 0.000000e+00 : f32
    %219 = vector.broadcast %cst_127 : f32 to vector<1x64xf32>
    %220 = tpu.concatenate %219, %218, %219 in 0 : vector<1x64xf32>, vector<16x64xf32>, vector<1x64xf32> -> vector<18x64xf32>
    %221 = vector.extract_strided_slice %220 {offsets = [0, 0], sizes = [16, 64], strides = [1, 1]} : vector<18x64xf32> to vector<16x64xf32>
    %222 = vector.extract_strided_slice %220 {offsets = [2, 0], sizes = [16, 64], strides = [1, 1]} : vector<18x64xf32> to vector<16x64xf32>
    %223 = tpu.concatenate %221, %218, %222 in 1 : vector<16x64xf32>, vector<16x64xf32>, vector<16x64xf32> -> vector<16x192xf32>
    %224 = arith.truncf %223 : vector<16x192xf32> to vector<16x192xbf16>
    %c0_128 = arith.constant 0 : index
    %c0_129 = arith.constant 0 : index
    %225 = vector.load %arg27[%c0_128, %c0_129] : memref<192x64xbf16, #tpu.memory_space<vmem>>, vector<192x64xbf16>
    %cst_130 = arith.constant dense<0.000000e+00> : vector<16x64xf32>
    %226 = tpu.matmul %224, %225, %cst_130 {dimension_numbers = #tpu.dot_dimension_numbers<[1], [0], [0], [1], [0, 0, 1, 1], [], []>} : vector<16x192xbf16>, vector<192x64xbf16>, vector<16x64xf32> -> vector<16x64xf32>
    %c0_131 = arith.constant 0 : index
    %c0_132 = arith.constant 0 : index
    %227 = vector.load %arg28[%c0_131, %c0_132] : memref<3x64xf32, #tpu.memory_space<vmem>>, vector<1x64xf32>
    %228 = vector.broadcast %227 : vector<1x64xf32> to vector<16x64xf32>
    %229 = arith.addf %226, %228 : vector<16x64xf32>
    %cst_133 = arith.constant 0.000000e+00 : f32
    %230 = vector.broadcast %cst_133 : f32 to vector<16x64xf32>
    %231 = arith.maximumf %229, %230 : vector<16x64xf32>
    %c1_134 = arith.constant 1 : index
    %c0_135 = arith.constant 0 : index
    %232 = vector.load %arg28[%c1_134, %c0_135] : memref<3x64xf32, #tpu.memory_space<vmem>>, vector<1x64xf32>
    %233 = vector.broadcast %232 : vector<1x64xf32> to vector<16x64xf32>
    %234 = arith.mulf %231, %233 : vector<16x64xf32>
    %c2_136 = arith.constant 2 : index
    %c0_137 = arith.constant 0 : index
    %235 = vector.load %arg28[%c2_136, %c0_137] : memref<3x64xf32, #tpu.memory_space<vmem>>, vector<1x64xf32>
    %236 = vector.broadcast %235 : vector<1x64xf32> to vector<16x64xf32>
    %237 = arith.addf %234, %236 : vector<16x64xf32>
    %cst_138 = arith.constant 0.000000e+00 : f32
    %238 = vector.broadcast %cst_138 : f32 to vector<1x64xf32>
    %239 = tpu.concatenate %238, %237, %238 in 0 : vector<1x64xf32>, vector<16x64xf32>, vector<1x64xf32> -> vector<18x64xf32>
    %240 = vector.extract_strided_slice %239 {offsets = [0, 0], sizes = [16, 64], strides = [1, 1]} : vector<18x64xf32> to vector<16x64xf32>
    %241 = vector.extract_strided_slice %239 {offsets = [2, 0], sizes = [16, 64], strides = [1, 1]} : vector<18x64xf32> to vector<16x64xf32>
    %242 = tpu.concatenate %240, %237, %241 in 1 : vector<16x64xf32>, vector<16x64xf32>, vector<16x64xf32> -> vector<16x192xf32>
    %243 = arith.truncf %242 : vector<16x192xf32> to vector<16x192xbf16>
    %c0_139 = arith.constant 0 : index
    %c0_140 = arith.constant 0 : index
    %244 = vector.load %arg29[%c0_139, %c0_140] : memref<192x128xbf16, #tpu.memory_space<vmem>>, vector<192x128xbf16>
    %cst_141 = arith.constant dense<0.000000e+00> : vector<16x128xf32>
    %245 = tpu.matmul %243, %244, %cst_141 {dimension_numbers = #tpu.dot_dimension_numbers<[1], [0], [0], [1], [0, 0, 1, 1], [], []>} : vector<16x192xbf16>, vector<192x128xbf16>, vector<16x128xf32> -> vector<16x128xf32>
    %c0_142 = arith.constant 0 : index
    %c0_143 = arith.constant 0 : index
    %246 = vector.load %arg30[%c0_142, %c0_143] : memref<3x128xf32, #tpu.memory_space<vmem>>, vector<1x128xf32>
    %247 = vector.broadcast %246 : vector<1x128xf32> to vector<16x128xf32>
    %248 = arith.addf %245, %247 : vector<16x128xf32>
    %249 = vector.shape_cast %248 : vector<16x128xf32> to vector<1x16x128xf32>
    %c0_144 = arith.constant 0 : index
    %c0_145 = arith.constant 0 : index
    %c0_146 = arith.constant 0 : index
    %250 = vector.load %arg31[%c0_144, %c0_145, %c0_146] : memref<1x16x128xf32, #tpu.memory_space<vmem>>, vector<1x16x128xf32>
    tpu.vector_store %arg31[%c0_144, %c0_145, %c0_146], %249 {strides = array<i32>} : memref<1x16x128xf32, #tpu.memory_space<vmem>>, vector<1x16x128xf32>,
    return
  }
  func.func @transform_0(%arg0: i32) -> (i32, i32, i32) {
    %c0_i32 = arith.constant 0 : i32
    %c0_i32_0 = arith.constant 0 : i32
    %c0_i32_1 = arith.constant 0 : i32
    return %arg0, %c0_i32, %c0_i32_0 : i32, i32, i32
  }
  func.func @transform_1(%arg0: i32) -> (i32, i32) {
    %c0_i32 = arith.constant 0 : i32
    %c0_i32_0 = arith.constant 0 : i32
    %c0_i32_1 = arith.constant 0 : i32
    return %c0_i32, %c0_i32_0 : i32, i32
  }
  func.func @transform_2(%arg0: i32) -> (i32, i32) {
    %c0_i32 = arith.constant 0 : i32
    %c0_i32_0 = arith.constant 0 : i32
    %c0_i32_1 = arith.constant 0 : i32
    return %c0_i32, %c0_i32_0 : i32, i32
  }
  func.func @transform_3(%arg0: i32) -> (i32, i32) {
    %c0_i32 = arith.constant 0 : i32
    %c0_i32_0 = arith.constant 0 : i32
    %c0_i32_1 = arith.constant 0 : i32
    return %c0_i32, %c0_i32_0 : i32, i32
  }
  func.func @transform_4(%arg0: i32) -> (i32, i32) {
    %c0_i32 = arith.constant 0 : i32
    %c0_i32_0 = arith.constant 0 : i32
    %c0_i32_1 = arith.constant 0 : i32
    return %c0_i32, %c0_i32_0 : i32, i32
  }
  func.func @transform_5(%arg0: i32) -> (i32, i32) {
    %c0_i32 = arith.constant 0 : i32
    %c0_i32_0 = arith.constant 0 : i32
    %c0_i32_1 = arith.constant 0 : i32
    return %c0_i32, %c0_i32_0 : i32, i32
  }
  func.func @transform_6(%arg0: i32) -> (i32, i32) {
    %c0_i32 = arith.constant 0 : i32
    %c0_i32_0 = arith.constant 0 : i32
    %c0_i32_1 = arith.constant 0 : i32
    return %c0_i32, %c0_i32_0 : i32, i32
  }
  func.func @transform_7(%arg0: i32) -> (i32, i32) {
    %c0_i32 = arith.constant 0 : i32
    %c0_i32_0 = arith.constant 0 : i32
    %c0_i32_1 = arith.constant 0 : i32
    return %c0_i32, %c0_i32_0 : i32, i32
  }
  func.func @transform_8(%arg0: i32) -> (i32, i32) {
    %c0_i32 = arith.constant 0 : i32
    %c0_i32_0 = arith.constant 0 : i32
    %c0_i32_1 = arith.constant 0 : i32
    return %c0_i32, %c0_i32_0 : i32, i32
  }
  func.func @transform_9(%arg0: i32) -> (i32, i32) {
    %c0_i32 = arith.constant 0 : i32
    %c0_i32_0 = arith.constant 0 : i32
    %c0_i32_1 = arith.constant 0 : i32
    return %c0_i32, %c0_i32_0 : i32, i32
  }
  func.func @transform_10(%arg0: i32) -> (i32, i32) {
    %c0_i32 = arith.constant 0 : i32
    %c0_i32_0 = arith.constant 0 : i32
    %c0_i32_1 = arith.constant 0 : i32
    return %c0_i32, %c0_i32_0 : i32, i32
  }
  func.func @transform_11(%arg0: i32) -> (i32, i32) {
    %c0_i32 = arith.constant 0 : i32
    %c0_i32_0 = arith.constant 0 : i32
    %c0_i32_1 = arith.constant 0 : i32
    return %c0_i32, %c0_i32_0 : i32, i32
  }
  func.func @transform_12(%arg0: i32) -> (i32, i32) {
    %c0_i32 = arith.constant 0 : i32
    %c0_i32_0 = arith.constant 0 : i32
    %c0_i32_1 = arith.constant 0 : i32
    return %c0_i32, %c0_i32_0 : i32, i32
  }
  func.func @transform_13(%arg0: i32) -> (i32, i32) {
    %c0_i32 = arith.constant 0 : i32
    %c0_i32_0 = arith.constant 0 : i32
    %c0_i32_1 = arith.constant 0 : i32
    return %c0_i32, %c0_i32_0 : i32, i32
  }
  func.func @transform_14(%arg0: i32) -> (i32, i32) {
    %c0_i32 = arith.constant 0 : i32
    %c0_i32_0 = arith.constant 0 : i32
    %c0_i32_1 = arith.constant 0 : i32
    return %c0_i32, %c0_i32_0 : i32, i32
  }
  func.func @transform_15(%arg0: i32) -> (i32, i32) {
    %c0_i32 = arith.constant 0 : i32
    %c0_i32_0 = arith.constant 0 : i32
    %c0_i32_1 = arith.constant 0 : i32
    return %c0_i32, %c0_i32_0 : i32, i32
  }
  func.func @transform_16(%arg0: i32) -> (i32, i32) {
    %c0_i32 = arith.constant 0 : i32
    %c0_i32_0 = arith.constant 0 : i32
    %c0_i32_1 = arith.constant 0 : i32
    return %c0_i32, %c0_i32_0 : i32, i32
  }
  func.func @transform_17(%arg0: i32) -> (i32, i32) {
    %c0_i32 = arith.constant 0 : i32
    %c0_i32_0 = arith.constant 0 : i32
    %c0_i32_1 = arith.constant 0 : i32
    return %c0_i32, %c0_i32_0 : i32, i32
  }
  func.func @transform_18(%arg0: i32) -> (i32, i32) {
    %c0_i32 = arith.constant 0 : i32
    %c0_i32_0 = arith.constant 0 : i32
    %c0_i32_1 = arith.constant 0 : i32
    return %c0_i32, %c0_i32_0 : i32, i32
  }
  func.func @transform_19(%arg0: i32) -> (i32, i32) {
    %c0_i32 = arith.constant 0 : i32
    %c0_i32_0 = arith.constant 0 : i32
    %c0_i32_1 = arith.constant 0 : i32
    return %c0_i32, %c0_i32_0 : i32, i32
  }
  func.func @transform_20(%arg0: i32) -> (i32, i32) {
    %c0_i32 = arith.constant 0 : i32
    %c0_i32_0 = arith.constant 0 : i32
    %c0_i32_1 = arith.constant 0 : i32
    return %c0_i32, %c0_i32_0 : i32, i32
  }
  func.func @transform_21(%arg0: i32) -> (i32, i32) {
    %c0_i32 = arith.constant 0 : i32
    %c0_i32_0 = arith.constant 0 : i32
    %c0_i32_1 = arith.constant 0 : i32
    return %c0_i32, %c0_i32_0 : i32, i32
  }
  func.func @transform_22(%arg0: i32) -> (i32, i32) {
    %c0_i32 = arith.constant 0 : i32
    %c0_i32_0 = arith.constant 0 : i32
    %c0_i32_1 = arith.constant 0 : i32
    return %c0_i32, %c0_i32_0 : i32, i32
  }
  func.func @transform_23(%arg0: i32) -> (i32, i32) {
    %c0_i32 = arith.constant 0 : i32
    %c0_i32_0 = arith.constant 0 : i32
    %c0_i32_1 = arith.constant 0 : i32
    return %c0_i32, %c0_i32_0 : i32, i32
  }
  func.func @transform_24(%arg0: i32) -> (i32, i32) {
    %c0_i32 = arith.constant 0 : i32
    %c0_i32_0 = arith.constant 0 : i32
    %c0_i32_1 = arith.constant 0 : i32
    return %c0_i32, %c0_i32_0 : i32, i32
  }
  func.func @transform_25(%arg0: i32) -> (i32, i32) {
    %c0_i32 = arith.constant 0 : i32
    %c0_i32_0 = arith.constant 0 : i32
    %c0_i32_1 = arith.constant 0 : i32
    return %c0_i32, %c0_i32_0 : i32, i32
  }
  func.func @transform_26(%arg0: i32) -> (i32, i32) {
    %c0_i32 = arith.constant 0 : i32
    %c0_i32_0 = arith.constant 0 : i32
    %c0_i32_1 = arith.constant 0 : i32
    return %c0_i32, %c0_i32_0 : i32, i32
  }
  func.func @transform_27(%arg0: i32) -> (i32, i32) {
    %c0_i32 = arith.constant 0 : i32
    %c0_i32_0 = arith.constant 0 : i32
    %c0_i32_1 = arith.constant 0 : i32
    return %c0_i32, %c0_i32_0 : i32, i32
  }
  func.func @transform_28(%arg0: i32) -> (i32, i32) {
    %c0_i32 = arith.constant 0 : i32
    %c0_i32_0 = arith.constant 0 : i32
    %c0_i32_1 = arith.constant 0 : i32
    return %c0_i32, %c0_i32_0 : i32, i32
  }
  func.func @transform_29(%arg0: i32) -> (i32, i32) {
    %c0_i32 = arith.constant 0 : i32
    %c0_i32_0 = arith.constant 0 : i32
    %c0_i32_1 = arith.constant 0 : i32
    return %c0_i32, %c0_i32_0 : i32, i32
  }
  func.func @transform_30(%arg0: i32) -> (i32, i32, i32) {
    %c0_i32 = arith.constant 0 : i32
    %c0_i32_0 = arith.constant 0 : i32
    %c0_i32_1 = arith.constant 0 : i32
    return %arg0, %c0_i32, %c0_i32_0 : i32, i32, i32
  }
}

</mosaic_0001>

<bundles_post_ra>
// kernel: tpu_custom_call.1
= control target key start
LH: loop header
LB: loop body
LE: loop exit
PB: predicated region body
PF: predicated region fallthrough
CT: control target
= control target key end

     0   :  { %s5781_s6 = smov 1   ;;  %s5782_s10 = smov 2   ;;  %s6584_s0 = inlined_call_operand.smem [shape: u32[31], index: -1, kind: input, shape index: {}] }
   0x1   :  { %s5823_s5 = sld [smem:[%s6584_s0]]   ;;  %s5783_s14 = smov 3  }
   0x2   :  { %s5828_s9 = sld [smem:[%s6584_s0 + %s5781_s6]]   ;;  %s5784_s18 = smov 4  }
   0x3   :  { %s5833_s13 = sld [smem:[%s6584_s0 + %s5782_s10]]   ;;  %s5785_s22 = smov 5  }
   0x4   :  { %s5838_s17 = sld [smem:[%s6584_s0 + %s5783_s14]]   ;;  %s5786_s26 = smov 6  }
   0x5   :  { %s5843_s21 = sld [smem:[%s6584_s0 + %s5784_s18]]   ;;  %s5787_s30 = smov 7  }
   0x6   :  { %s5848_s25 = sld [smem:[%s6584_s0 + %s5785_s22]]   ;;  %s5788_s4 = smov 8  }
   0x7   :  { %6615 = sst [smem:[#allocation5_spill]] %s5823_s5  ;;  %s5789_s10 = smov 9  }
   0x8   :  { %6616 = sst [smem:[#allocation6_spill]] %s5828_s9  ;;  %s5790_s15 = smov 10  }
   0x9   :  { %s5853_s29 = sld [smem:[%s6584_s0 + %s5786_s26]]   ;;  %s5791_s20 = smov 11  }
   0xa   :  { %s5858_s3 = sld [smem:[%s6584_s0 + %s5787_s30]]   ;;  %s5792_s26 = smov 12  }
   0xb   :  { %6617 = sst [smem:[#allocation7_spill]] %s5843_s21  ;;  %s5793_s1 = smov 13  }
   0xc   :  { %6618 = sst [smem:[#allocation8_spill]] %s5848_s25  ;;  %s5794_s7 = smov 14  }
   0xd   :  { %s5863_s8 = sld [smem:[%s6584_s0 + %s5788_s4]]   ;;  %s5796_s22 = smov 16  }
   0xe   :  { %s5868_s14 = sld [smem:[%s6584_s0 + %s5789_s10]]   ;;  %s5797_s28 = smov 17  }
   0xf   :  { %s5873_s19 = sld [smem:[%s6584_s0 + %s5790_s15]]   ;;  %s5795_s15 = smov 15  }
  0x10   :  { %6619 = sst [smem:[#allocation9_spill]] %s5858_s3 }
  0x11   :  { %s5878_s24 = sld [smem:[%s6584_s0 + %s5791_s20]]  }
  0x12   :  { %s5883_s30 = sld [smem:[%s6584_s0 + %s5792_s26]]  }
  0x13   :  { %6620 = sst [smem:[#allocation10_spill]] %s5863_s8 }
  0x14   :  { %s5888_s6 = sld [smem:[%s6584_s0 + %s5793_s1]]  }
  0x15   :  { %s5893_s12 = sld [smem:[%s6584_s0 + %s5794_s7]]   ;;  %s5798_s7 = smov 18  }
  0x16   :  { %s5898_s20 = sld [smem:[%s6584_s0 + %s5795_s15]]   ;;  %s5799_s15 = smov 19  }
  0x17   :  { %s5903_s27 = sld [smem:[%s6584_s0 + %s5796_s22]]   ;;  %s5800_s22 = smov 20  }
  0x18   :  { %s5908_s4 = sld [smem:[%s6584_s0 + %s5797_s28]]   ;;  %s5801_s28 = smov 21  }
  0x19   :  { %s5913_s21 = sld [smem:[%s6584_s0 + %s5798_s7]]   ;;  %s5802_s7 = smov 22  }
  0x1a   :  { %6621 = sst [smem:[#allocation11_spill]] %s5888_s6 }
  0x1b   :  { %6622 = sst [smem:[#allocation12_spill]] %s5893_s12 }
  0x1c   :  { %6623 = sst [smem:[#allocation13_spill]] %s5898_s20 }
  0x1d   :  { %s5918_s25 = sld [smem:[%s6584_s0 + %s5799_s15]]   ;;  %s5803_s15 = smov 23  }
  0x1e   :  { %6624 = sst [smem:[#allocation14_spill]] %s5908_s4 }
  0x1f   :  { %6625 = sst [smem:[#allocation15_spill]] %s5913_s21 }
  0x20   :  { %s5923_s20 = sld [smem:[%s6584_s0 + %s5800_s22]]   ;;  %s5804_s22 = smov 24  }
  0x21   :  { %s5928_s4 = sld [smem:[%s6584_s0 + %s5801_s28]]   ;;  %s5805_s28 = smov 25  }
  0x22   :  { %s5933_s21 = sld [smem:[%s6584_s0 + %s5802_s7]]   ;;  %s5806_s7 = smov 26  }
  0x23   :  { %6626 = sst [smem:[#allocation16_spill]] %s5918_s25 }
  0x24   :  { %s5938_s25 = sld [smem:[%s6584_s0 + %s5803_s15]]   ;;  %s5807_s15 = smov 27  }
  0x26   :  { %6627 = sst [smem:[#allocation17_spill]] %s5923_s20 }
  0x27   :  { %6628 = sst [smem:[#allocation18_spill]] %s5928_s4 }
  0x28   :  { %6629 = sst [smem:[#allocation19_spill]] %s5933_s21 }
  0x29   :  { %s5943_s20 = sld [smem:[%s6584_s0 + %s5804_s22]]   ;;  %s5808_s22 = smov 28  }
  0x2a   :  { %6630 = sst [smem:[#allocation20_spill]] %s5938_s25 }
  0x2b   :  { %s5948_s4 = sld [smem:[%s6584_s0 + %s5805_s28]]   ;;  %s5809_s28 = smov 29  }
  0x2c   :  { %s5953_s21 = sld [smem:[%s6584_s0 + %s5806_s7]]   ;;  %s5810_s7 = smov 30  }
  0x2d   :  { %s5958_s25 = sld [smem:[%s6584_s0 + %s5807_s15]]  }
  0x2f   :  { %6631 = sst [smem:[#allocation21_spill]] %s5943_s20 }
  0x30   :  { %s5963_s20 = sld [smem:[%s6584_s0 + %s5808_s22]]  }
  0x31   :  { %6632 = sst [smem:[#allocation22_spill]] %s5948_s4 }
  0x32   :  { %6633 = sst [smem:[#allocation23_spill]] %s5953_s21 }
  0x33   :  { %s5968_s4 = sld [smem:[%s6584_s0 + %s5809_s28]]  }
  0x34   :  { %s5973_s21 = sld [smem:[%s6584_s0 + %s5810_s7]]  }
  0x39   :  { %6634 = sst [smem:[#allocation24_spill]] %s5968_s4 }
  0x3a   :  { %66 = vsyncpa [#allocation3], 0 }
  0x3b   :  { %68 = vsyncpa [#allocation3 + $0x1], 0  ;;  %s5975_s15 = smov 0   ;;  %s5977_s16 = smov 0  }
  0x3c   :  { %s5979_s18 = smov 0   ;;  %s5981_s22 = smov 0  }
  0x3d LB: > { %s6635_s12 = sld [smem:[#allocation12_spill]]  ;;  %s5996_s0 = sadd.s32 4294967295, %s5779_s22   ;;  %s5779_s22 = sphi %s5981_s22, %s6665_s22   ;;  %s5775_s18 = sphi %s5979_s18, %s6664_s18   ;;  %s5771_s16 = sphi %s5977_s16, %s6663_s16   ;;  %s5767_s15 = sphi %s5975_s15, %s6662_s15  }
  0x3e   : > { %s6636_s8 = sld [smem:[#allocation10_spill]]  ;;  %s4230_s23 = sadd.s32 4294967294, %s5779_s22  }
  0x3f   : > { %s6637_s6 = sld [smem:[#allocation11_spill]]  ;;  %s6000_s26 = sadd.s32 1, %s5779_s22  }
  0x40   : > { %s6638_s3 = sld [smem:[#allocation9_spill]]  ;;  %s716_s28 = sadd.s32 1, %s5775_s18 }
  0x41   : > { %s713_s1 = ssub.s32 %s5779_s22, %s6000_s26  ;;  %p726_p0 = scmp.ne.s32.totalorder %s5775_s18, %s5771_s16 }
  0x42   : > { %p714_p1 = scmp.eq.s32.totalorder %s713_s1, 0  ;;  %p727_p2 = scmp.eq.s32.totalorder %s5996_s0, 1 }
  0x43   : > { %p732_p3 = scmp.ne.s32.totalorder %s5771_s16, %s5767_s15  ;;  %p733_p4 = scmp.eq.s32.totalorder %s4230_s23, 1 }
  0x44   : > { %s6011_s2 = scalar_select %p714_p1, %s5775_s18, %s716_s28  }
  0x45   : > { %p6013_p5 = por %p727_p2, %p726_p0  ;;  %p6017_p6 = por %p733_p4, %p732_p3 }
  0x46   : > { %p4233_p7 = scmp.ge.s32.totalorder %s5779_s22, 1  ;;  %p846_p8 = scmp.lt.s32.totalorder %s5779_s22, 3 }
  0x48   : > { %p847_p9 = pnand %p4233_p7, %p846_p8 }
  0x49   : > { %p924_p10 = scmp.lt.s32.totalorder (!%p847_p9), %s5996_s0, 1  ;;  %s6641_s5 = sld [smem:[#allocation5_spill]] (!%p847_p9) }
  0x4a   : > { %850 = sbr.rel (%p847_p9) target bundleno = 3248 (0xcb0), region = 140  ;;  %s6601_s1 = smov (!%p847_p9), 64  }
  0x4b   : > { %s6646_s9 = sld [smem:[#allocation6_spill]] (!%p847_p9) }
  0x4c   : > { %s6661_s4 = sld [smem:[#allocation24_spill]] (!%p847_p9) }
  0x4f   : > { %v5321_v0 = vld [vmem:[%s5853_s29 + $0x38] sm:$0xff]  ;;  %v5320_v3 = vld [vmem:[%s5853_s29 + $0x30] sm:$0xff]  ;;  %s925_s11 = scalar_select %p924_p10, %s5996_s0, 1  ;;  %v5319_v8 = vld [vmem:[%s5853_s29 + $0x28] sm:$0xff]  ;;  %vm934_vm0 = vcmask 1042432   ;;  %vm953_vm1 = vcmask 1045504  }
  0x50   : > { %v5329_v1 = vld [vmem:[%s5853_s29 + $0x78] sm:$0xff]  ;;  %1441 = vmatpush.bf16.msra.mxu0 %v5321_v0  ;;  %v5328_v4 = vld [vmem:[%s5853_s29 + $0x70] sm:$0xff]  ;;  %v5327_v9 = vld [vmem:[%s5853_s29 + $0x68] sm:$0xff]  ;;  %vm945_vm2 = vcmask 1046528   ;;  %vm5811_vm4 = vmmov 1   ;;  %vm961_vm6 = vcmask 1043456  }
  0x51   : > { %v5337_v2 = vld [vmem:[%s5853_s29 + $0xb8] sm:$0xff]  ;;  %1455 = vmatpush.bf16.msra.mxu1 %v5329_v1  ;;  %v5336_v6 = vld [vmem:[%s5853_s29 + $0xb0] sm:$0xff]  ;;  %s5313_s23 = sshll.u32 %s925_s11, 4  ;;  %v5335_v10 = vld [vmem:[%s5853_s29 + $0xa8] sm:$0xff]  ;;  %vm976_vm7 = vcmask 1041408   ;;  %vm1551_vm8 = vcmask 1040384  }
  0x52   : > { %v5345_v5 = vld [vmem:[%s5853_s29 + $0xf8] sm:$0xff]  ;;  %1469 = vmatpush.bf16.msra.mxu2 %v5337_v2  ;;  %v5344_v7 = vld [vmem:[%s5853_s29 + $0xf0] sm:$0xff]  ;;  %v5343_v11 = vld [vmem:[%s5853_s29 + $0xe8] sm:$0xff]  ;;  %s928_s28 = scalar_lea.vmem %s6641_s5, %s5313_s23  ;;  %vm1575_vm9 = vcmask 523264   ;;  %vm1998_vm12 = vcmask 130048   ;;  %s6647_s11 = sld [smem:[#allocation15_spill]] }
  0x53   : > { %1483 = vmatpush.bf16.msra.mxu3 %v5345_v5  ;;  %v5318_v12 = vld [vmem:[%s5853_s29 + $0x20] sm:$0xff]  ;;  %v6044_v17 = vld [vmem:[%s928_s28 + $0x8] sm:$0xff]  ;;  %v5317_v19 = vld [vmem:[%s5853_s29 + $0x18] sm:$0xff]  ;;  %s6648_s23 = sld [smem:[#allocation13_spill]]  ;;  %vm3204_vm14 = vcmask 64512  }
  0x54   : > { %1442 = vmatpush.bf16.msra.mxu0 %v5320_v3  ;;  %v5326_v13 = vld [vmem:[%s5853_s29 + $0x60] sm:$0xff]  ;;  %v5325_v20 = vld [vmem:[%s5853_s29 + $0x58] sm:$0xff]  ;;  %v936_v21 = vrot.slane %v6044_v17, 5  ;;  %v5316_v24 = vld [vmem:[%s5853_s29 + $0x10] sm:$0xff]  ;;  %s6651_s5 = sld [smem:[#allocation16_spill]] }
  0x55   : > { %1456 = vmatpush.bf16.msra.mxu1 %v5328_v4  ;;  %v5334_v14 = vld [vmem:[%s5853_s29 + $0xa0] sm:$0xff]  ;;  %v5333_v22 = vld [vmem:[%s5853_s29 + $0x98] sm:$0xff]  ;;  %v5324_v25 = vld [vmem:[%s5853_s29 + $0x50] sm:$0xff] }
  0x56   : > { %1470 = vmatpush.bf16.msra.mxu2 %v5336_v6  ;;  %v5342_v15 = vld [vmem:[%s5853_s29 + $0xe0] sm:$0xff]  ;;  %v5341_v23 = vld [vmem:[%s5853_s29 + $0xd8] sm:$0xff]  ;;  %v5332_v27 = vld [vmem:[%s5853_s29 + $0x90] sm:$0xff]  ;;  %v6063_v29 = vsel %vm934_vm0, %v936_v21, 0.0 }
  0x57   : > { %1484 = vmatpush.bf16.msra.mxu3 %v5344_v7  ;;  %v6042_v16 = vld [vmem:[%s928_s28] sm:$0xff]  ;;  %v5340_v28 = vld [vmem:[%s5853_s29 + $0xd0] sm:$0xff]  ;;  %v5315_v31 = vld [vmem:[%s5853_s29 + $0x8] sm:$0xff]  ;;  %v957_v37 = vrot.slane %v6063_v29, 2  ;;  %v949_v39 = vrot.slane %v6063_v29, 1  ;;  %s6649_s28 = sld [smem:[#allocation14_spill]] }
  0x58   : > { %1443 = vmatpush.bf16.msra.mxu0 %v5319_v8  ;;  %v6047_v18 = vrot.slane %v6042_v16, 5  ;;  %v5323_v32 = vld [vmem:[%s5853_s29 + $0x48] sm:$0xff]  ;;  %v5314_v40 = vld [vmem:[%s5853_s29] sm:$0xff]  ;;  %v5353_v44 = vld [vmem:[%s5853_s29 + $0x138] sm:$0xff]  ;;  %v987_v58 = vpack.c.bf16 %v6044_v17, %v6042_v16 }
  0x59   : > { %1457 = vmatpush.bf16.msra.mxu1 %v5327_v9  ;;  %v5331_v35 = vld [vmem:[%s5853_s29 + $0x88] sm:$0xff]  ;;  %v5322_v41 = vld [vmem:[%s5853_s29 + $0x40] sm:$0xff]  ;;  %vm4461_vm3 = vmneg %vm934_vm0 }
  0x5a   : > { %1471 = vmatpush.bf16.msra.mxu2 %v5335_v10  ;;  %v6058_v26 = vsel %vm934_vm0, 0.0, %v6047_v18  ;;  %v6067_v30 = vsel %vm934_vm0, %v6047_v18, %v936_v21  ;;  %v5339_v42 = vld [vmem:[%s5853_s29 + $0xc8] sm:$0xff]  ;;  %v5330_v43 = vld [vmem:[%s5853_s29 + $0x80] sm:$0xff]  ;;  %v5361_v45 = vld [vmem:[%s5853_s29 + $0x178] sm:$0xff]  ;;  %v965_v10 = vrot.slane %v6063_v29, 4 }
  0x5b   : > { %1485 = vmatpush.bf16.msra.mxu3 %v5343_v11  ;;  %v954_v33 = vrot.slane %v6058_v26, 2  ;;  %v946_v34 = vrot.slane %v6058_v26, 1  ;;  %v955_v36 = vrot.slane %v6067_v30, 2  ;;  %v947_v38 = vrot.slane %v6067_v30, 1  ;;  %v5369_v46 = vld [vmem:[%s5853_s29 + $0x1b8] sm:$0xff]  ;;  %v5338_v51 = vld [vmem:[%s5853_s29 + $0xc0] sm:$0xff]  ;;  %vm4462_vm5 = vmpackc.low %vm5811_vm4, %vm4461_vm3 }
  0x5c   : > { %1444 = vmatpush.bf16.msra.mxu0 %v5318_v12  ;;  %v5352_v52 = vld [vmem:[%s5853_s29 + $0x130] sm:$0xff]  ;;  %v4463_v53 = vpack.c.bf16 %v6067_v30, %v6047_v18  ;;  %v5351_v59 = vld [vmem:[%s5853_s29 + $0x128] sm:$0xff]  ;;  %v5350_v62 = vld [vmem:[%s5853_s29 + $0x120] sm:$0xff]  ;;  %v962_v7 = vrot.slane %v6058_v26, 4  ;;  %v963_v8 = vrot.slane %v6067_v30, 4  ;;  %v969_v11 = vrot.slane %v6058_v26, 5 }
  0x5d   : > { %1458 = vmatpush.bf16.msra.mxu1 %v5326_v13  ;;  %v956_v47 = vsel %vm953_vm1, %v954_v33, %v955_v36  ;;  %v958_v48 = vsel %vm953_vm1, %v955_v36, %v957_v37  ;;  %v948_v49 = vsel %vm945_vm2, %v946_v34, %v947_v38  ;;  %v950_v50 = vsel %vm945_vm2, %v947_v38, %v949_v39  ;;  %v5360_v54 = vld [vmem:[%s5853_s29 + $0x170] sm:$0xff]  ;;  %v5359_v60 = vld [vmem:[%s5853_s29 + $0x168] sm:$0xff]  ;;  %v5358_v63 = vld [vmem:[%s5853_s29 + $0x160] sm:$0xff] }
  0x5e   : > { %1472 = vmatpush.bf16.msra.mxu2 %v5334_v14  ;;  %v986_v55 = vpack.c.bf16 %v958_v48, %v956_v47  ;;  %v985_v56 = vpack.c.bf16 %v950_v50, %v948_v49  ;;  %v5368_v57 = vld [vmem:[%s5853_s29 + $0x1b0] sm:$0xff]  ;;  %v5367_v61 = vld [vmem:[%s5853_s29 + $0x1a8] sm:$0xff]  ;;  %v5366_v0 = vld [vmem:[%s5853_s29 + $0x1a0] sm:$0xff]  ;;  %v970_v12 = vrot.slane %v6067_v30, 5  ;;  %v977_v16 = vrot.slane %v6058_v26, 6 }
  0x5f   : > { %1486 = vmatpush.bf16.msra.mxu3 %v5342_v15  ;;  %v5349_v1 = vld [vmem:[%s5853_s29 + $0x118] sm:$0xff]  ;;  %v5348_v4 = vld [vmem:[%s5853_s29 + $0x110] sm:$0xff]  ;;  %v5347_v9 = vld [vmem:[%s5853_s29 + $0x108] sm:$0xff]  ;;  %v972_v15 = vrot.slane %v6063_v29, 5  ;;  %v978_v17 = vrot.slane %v6067_v30, 6  ;;  %v980_v18 = vrot.slane %v6063_v29, 6  ;;  %v966_v21 = vsel %vm961_vm6, %v963_v8, %v965_v10 }
  0x60   : > { %1445 = vmatpush.bf16.msra.mxu0 %v5317_v19  ;;  %v5357_v2 = vld [vmem:[%s5853_s29 + $0x158] sm:$0xff]  ;;  %v5356_v5 = vld [vmem:[%s5853_s29 + $0x150] sm:$0xff]  ;;  %v5355_v13 = vld [vmem:[%s5853_s29 + $0x148] sm:$0xff] }
  0x61   : > { %1459 = vmatpush.bf16.msra.mxu1 %v5325_v20  ;;  %v5365_v3 = vld [vmem:[%s5853_s29 + $0x198] sm:$0xff]  ;;  %v5364_v6 = vld [vmem:[%s5853_s29 + $0x190] sm:$0xff]  ;;  %v5363_v14 = vld [vmem:[%s5853_s29 + $0x188] sm:$0xff]  ;;  %v964_v20 = vsel %vm961_vm6, %v962_v7, %v963_v8  ;;  %v979_v26 = vsel %vm976_vm7, %v977_v16, %v978_v17 }
  0x62   : > { %1473 = vmatpush.bf16.msra.mxu2 %v5333_v22  ;;  %v5346_v19 = vld [vmem:[%s5853_s29 + $0x100] sm:$0xff]  ;;  %v971_v22 = vsel %vm934_vm0, %v969_v11, %v970_v12  ;;  %v5375_v48 = vld [vmem:[%s6636_s8 + $0x28] sm:$0xff]  ;;  %vm6206_vm10 = vmneg %vm1551_vm8 }
  0x63   : > { %1487 = vmatpush.bf16.msra.mxu3 %v5341_v23  ;;  %v5354_v23 = vld [vmem:[%s5853_s29 + $0x140] sm:$0xff]  ;;  %v5371_v7 = vld [vmem:[%s6636_s8 + $0x8] sm:$0xff]  ;;  %vm6214_vm11 = vmpackc.low %vm5811_vm4, %vm6206_vm10 }
  0x64   : > { %1446 = vmatpush.bf16.msra.mxu0 %v5316_v24  ;;  %v5362_v24 = vld [vmem:[%s5853_s29 + $0x180] sm:$0xff]  ;;  %vm4762_vm13 = vmpackc.low %vm6206_vm10, %vm6206_vm10 }
  0x65   : > { %1460 = vmatpush.bf16.msra.mxu1 %v5324_v25  ;;  %v973_v25 = vsel %vm934_vm0, %v970_v12, %v972_v15 }
  0x66   : > { %1474 = vmatpush.bf16.msra.mxu2 %v5332_v27  ;;  %v981_v27 = vsel %vm976_vm7, %v978_v17, %v980_v18  ;;  %v989_v29 = vpack.c.bf16 %v973_v25, %v971_v22  ;;  %v5380_v25 = vld [vmem:[%s6636_s8 + $0x50] sm:$0xff] }
  0x67   : > { %1488 = vmatpush.bf16.msra.mxu3 %v5340_v28  ;;  %v988_v28 = vpack.c.bf16 %v966_v21, %v964_v20  ;;  %v990_v30 = vpack.c.bf16 %v981_v27, %v979_v26  ;;  %v5379_v26 = vld [vmem:[%s6636_s8 + $0x48] sm:$0xff]  ;;  %v5378_v27 = vld [vmem:[%s6636_s8 + $0x40] sm:$0xff] }
  0x68   : > { %1447 = vmatpush.bf16.msra.mxu0 %v5315_v31 }
  0x69   : > { %1461 = vmatpush.bf16.msra.mxu1 %v5323_v32  ;;  %v5683_v32 = vld [vmem:[%s6638_s3] ss:$0 sm:$0xff] }
  0x6a   : > { %1475 = vmatpush.bf16.msra.mxu2 %v5331_v35 }
  0x6b   : > { %1489 = vmatpush.bf16.msra.mxu3 %v5339_v42 }
  0x6c   : > { %1448 = vmatpush.bf16.msra.mxu0 %v5314_v40  ;;  %v5377_v40 = vld [vmem:[%s6636_s8 + $0x38] sm:$0xff] }
  0x6d   : > { %1462 = vmatpush.bf16.msra.mxu1 %v5322_v41 }
  0x6e   : > { %1476 = vmatpush.bf16.msra.mxu2 %v5330_v43  ;;  %v5376_v43 = vld [vmem:[%s6636_s8 + $0x30] sm:$0xff] }
  0x6f   : > { %1490 = vmatpush.bf16.msra.mxu3 %v5338_v51  ;;  %4464 = vmatmul.msk.bf16.vlgmr.msra.gmra.mxu0 %vm4462_vm5, %v4463_v53  ;;  %v5374_v53 = vld [vmem:[%s6636_s8 + $0x20] sm:$0xff] }
  0x70   : > { %1497 = vmatpush.bf16.msrb.mxu0 %v5353_v44  ;;  %1463 = vmatmul.bf16.vlgmr.msra.gmra.mxu1 %v985_v56 }
  0x71   : > { %1511 = vmatpush.bf16.msrb.mxu1 %v5361_v45  ;;  %1477 = vmatmul.bf16.vlgmr.msra.gmra.mxu2 %v986_v55 }
  0x72   : > { %1525 = vmatpush.bf16.msrb.mxu2 %v5369_v46  ;;  %1491 = vmatmul.bf16.vlgmr.msra.gmra.mxu3 %v987_v58  ;;  %v5684_v58 = vld [vmem:[%s6638_s3 + $0x1] ss:$0 sm:$0xff] }
  0x73   : > { %1681 = vmatpush.bf16.msrb.mxu3 %v5377_v40  ;;  %v5395_v40 = vld [vmem:[%s5873_s19 + $0x68] sm:$0xff] }
  0x74   : > { %1498 = vmatpush.bf16.msrb.mxu0 %v5352_v52 }
  0x75   : > { %1512 = vmatpush.bf16.msrb.mxu1 %v5360_v54 }
  0x76   : > { %1526 = vmatpush.bf16.msrb.mxu2 %v5368_v57 }
  0x77   : > { %1682 = vmatpush.bf16.msrb.mxu3 %v5376_v43  ;;  %v5394_v43 = vld [vmem:[%s5873_s19 + $0x60] sm:$0xff] }
  0x78   : > { %1499 = vmatpush.bf16.msrb.mxu0 %v5351_v59 }
  0x79   : > { %1513 = vmatpush.bf16.msrb.mxu1 %v5359_v60  ;;  %v5373_v60 = vld [vmem:[%s6636_s8 + $0x18] sm:$0xff] }
  0x7a   : > { %1527 = vmatpush.bf16.msrb.mxu2 %v5367_v61 }
  0x7b   : > { %1683 = vmatpush.bf16.msrb.mxu3 %v5375_v48  ;;  %v5385_v48 = vld [vmem:[%s5873_s19 + $0x18] sm:$0xff] }
  0x7c   : > { %1500 = vmatpush.bf16.msrb.mxu0 %v5350_v62 }
  0x7d   : > { %1514 = vmatpush.bf16.msrb.mxu1 %v5358_v63 }
  0x7e   : > { %1528 = vmatpush.bf16.msrb.mxu2 %v5366_v0  ;;  %v5685_v0 = vld [vmem:[%s6638_s3 + $0x2] ss:$0 sm:$0xff]  ;;  %s6650_s3 = sld [smem:[#allocation17_spill]] }
  0x7f   : > { %1684 = vmatpush.bf16.msrb.mxu3 %v5374_v53  ;;  %v5400_v53 = vld [vmem:[%s5873_s19 + $0x90] sm:$0xff] }
  0x80   : > { %1501 = vmatpush.bf16.msrb.mxu0 %v5349_v1 }
  0x81   : > { %1515 = vmatpush.bf16.msrb.mxu1 %v5357_v2  ;;  %v5372_v2 = vld [vmem:[%s6636_s8 + $0x10] sm:$0xff] }
  0x82   : > { %1529 = vmatpush.bf16.msrb.mxu2 %v5365_v3 }
  0x83   : > { %1685 = vmatpush.bf16.msrb.mxu3 %v5373_v60 }
  0x84   : > { %1502 = vmatpush.bf16.msrb.mxu0 %v5348_v4 }
  0x85   : > { %1516 = vmatpush.bf16.msrb.mxu1 %v5356_v5 }
  0x86   : > { %1530 = vmatpush.bf16.msrb.mxu2 %v5364_v6 }
  0x87   : > { %1686 = vmatpush.bf16.msrb.mxu3 %v5372_v2 }
  0x88   : > { %1503 = vmatpush.bf16.msrb.mxu0 %v5347_v9 }
  0x89   : > { %1517 = vmatpush.bf16.msrb.mxu1 %v5355_v13 }
  0x8a   : > { %1531 = vmatpush.bf16.msrb.mxu2 %v5363_v14 }
  0x8b   : > { %1687 = vmatpush.bf16.msrb.mxu3 %v5371_v7 }
  0x8c   : > { %1504 = vmatpush.bf16.msrb.mxu0 %v5346_v19 }
  0x8d   : > { %1518 = vmatpush.bf16.msrb.mxu1 %v5354_v23  ;;  %v5370_v23 = vld [vmem:[%s6636_s8] sm:$0xff] }
  0x8e   : > { %1532 = vmatpush.bf16.msrb.mxu2 %v5362_v24  ;;  %v5381_v24 = vld [vmem:[%s6636_s8 + $0x58] sm:$0xff] }
  0x8f   : > { %1505 = vmatmul.bf16.vlgmr.msrb.gmra.mxu0 %v988_v28  ;;  %1688 = vmatpush.bf16.msrb.mxu3 %v5370_v23 }
  0x90   : > { %1519 = vmatmul.bf16.vlgmr.msrb.gmra.mxu1 %v989_v29 }
  0x91   : > { %1533 = vmatmul.bf16.vlgmr.msrb.gmra.mxu2 %v990_v30 }
  0x93   : > { %1699 = vmatpush.bf16.msra.mxu3 %v5381_v24 }
  0x97   : > { %1700 = vmatpush.bf16.msra.mxu3 %v5380_v25 }
  0x9b   : > { %1701 = vmatpush.bf16.msra.mxu3 %v5379_v26 }
  0x9f   : > { %1702 = vmatpush.bf16.msra.mxu3 %v5378_v27 }
  0xec   : > { %v1450_v31 = vpop.f32.mrf.mxu0 }
  0xed   : > { %v1464_v33 = vpop.f32.mrf.mxu1  ;;  %v1451_v34 = vadd.f32 %v5683_v32, %v1450_v31 }
  0xef   : > { %v1465_v36 = vadd.f32 %v1464_v33, %v1451_v34 }
  0xf4   : > { %v1478_v35 = vpop.f32.mrf.mxu2  ;;  %v1452_v37 = vpop.f32.mrf.mxu0 }
  0xf5   : > { %v1492_v38 = vpop.f32.mrf.mxu3  ;;  %v1466_v39 = vpop.f32.mrf.mxu1  ;;  %v1479_v41 = vadd.f32 %v1478_v35, %v1465_v36  ;;  %v1453_v42 = vadd.f32 %v5683_v32, %v1452_v37  ;;  %v5397_v35 = vld [vmem:[%s5873_s19 + $0x78] sm:$0xff]  ;;  %v5396_v37 = vld [vmem:[%s5873_s19 + $0x70] sm:$0xff] }
  0xf6   : > { %v5389_v36 = vld [vmem:[%s5873_s19 + $0x38] sm:$0xff]  ;;  %1949 = vmatpush.bf16.msra.mxu2 %v5397_v35 }
  0xf7   : > { %v1493_v45 = vadd.f32 %v1492_v38, %v1479_v41  ;;  %v1467_v46 = vadd.f32 %v1466_v39, %v1453_v42  ;;  %1935 = vmatpush.bf16.msra.mxu1 %v5389_v36  ;;  %v5405_v38 = vld [vmem:[%s5873_s19 + $0xb8] sm:$0xff]  ;;  %v5388_v39 = vld [vmem:[%s5873_s19 + $0x30] sm:$0xff]  ;;  %v5387_v42 = vld [vmem:[%s5873_s19 + $0x28] sm:$0xff] }
  0xf8   : > { %v5404_v41 = vld [vmem:[%s5873_s19 + $0xb0] sm:$0xff] }
  0xfa   : > { %1950 = vmatpush.bf16.msra.mxu2 %v5396_v37  ;;  %v2073_v37 = vld [vmem:[%s5838_s17 + $0x78] sm:$0xff] }
  0xfb   : > { %1936 = vmatpush.bf16.msra.mxu1 %v5388_v39  ;;  %v2072_v39 = vld [vmem:[%s5838_s17 + $0x70] sm:$0xff] }
  0xfc   : > { %v1480_v44 = vpop.f32.mrf.mxu2 }
  0xfd   : > { %v1481_v51 = vadd.f32 %v1480_v44, %v1467_v46  ;;  %v1494_v52 = vpop.f32.mrf.mxu3  ;;  %v5403_v44 = vld [vmem:[%s5873_s19 + $0xa8] sm:$0xff]  ;;  %v5393_v46 = vld [vmem:[%s5873_s19 + $0x58] sm:$0xff] }
  0xfe   : > { %1951 = vmatpush.bf16.msra.mxu2 %v5395_v40  ;;  %v2071_v40 = vld [vmem:[%s5838_s17 + $0x68] sm:$0xff] }
  0xff   : > { %v1495_v56 = vadd.f32 %v1494_v52, %v1481_v51  ;;  %1937 = vmatpush.bf16.msra.mxu1 %v5387_v42  ;;  %v5384_v51 = vld [vmem:[%s5873_s19 + $0x10] sm:$0xff]  ;;  %v5391_v52 = vld [vmem:[%s5873_s19 + $0x48] sm:$0xff] }
 0x102   : > { %1952 = vmatpush.bf16.msra.mxu2 %v5394_v43 }
 0x106   : > { %1953 = vmatpush.bf16.msra.mxu2 %v5393_v46  ;;  %v2069_v46 = vld [vmem:[%s5838_s17 + $0x58] sm:$0xff] }
 0x10c   : > { %v1506_v47 = vpop.f32.mrf.mxu0 }
 0x10d   : > { %v1507_v49 = vadd.f32 %v1506_v47, %v1493_v45  ;;  %v1520_v50 = vpop.f32.mrf.mxu1  ;;  %v5386_v45 = vld [vmem:[%s5873_s19 + $0x20] sm:$0xff] }
 0x10e   : > { %1938 = vmatpush.bf16.msra.mxu1 %v5386_v45  ;;  %v5402_v47 = vld [vmem:[%s5873_s19 + $0xa0] sm:$0xff] }
 0x10f   : > { %v1521_v54 = vadd.f32 %v1520_v50, %v1507_v49  ;;  %v5392_v49 = vld [vmem:[%s5873_s19 + $0x50] sm:$0xff]  ;;  %v5401_v50 = vld [vmem:[%s5873_s19 + $0x98] sm:$0xff] }
 0x110   : > { %1954 = vmatpush.bf16.msra.mxu2 %v5392_v49  ;;  %v2068_v49 = vld [vmem:[%s5838_s17 + $0x50] sm:$0xff] }
 0x112   : > { %1939 = vmatpush.bf16.msra.mxu1 %v5385_v48 }
 0x114   : > { %v1534_v55 = vpop.f32.mrf.mxu2  ;;  %v1508_v59 = vpop.f32.mrf.mxu0  ;;  %1955 = vmatpush.bf16.msra.mxu2 %v5391_v52  ;;  %v2067_v52 = vld [vmem:[%s5838_s17 + $0x48] sm:$0xff] }
 0x115   : > { %v1535_v57 = vadd.f32 %v1534_v55, %v1521_v54  ;;  %v1509_v62 = vadd.f32 %v1508_v59, %v1495_v56  ;;  %v1522_v1 = vpop.f32.mrf.mxu1  ;;  %v5383_v54 = vld [vmem:[%s5873_s19 + $0x8] sm:$0xff]  ;;  %v5390_v55 = vld [vmem:[%s5873_s19 + $0x40] sm:$0xff] }
 0x116   : > { %1940 = vmatpush.bf16.msra.mxu1 %v5384_v51  ;;  %v5398_v59 = vld [vmem:[%s5873_s19 + $0x80] sm:$0xff] }
 0x117   : > { %v1539_v61 = vmax.f32 %v1535_v57, 0.0  ;;  %v1523_v3 = vadd.f32 %v1522_v1, %v1509_v62  ;;  %v5399_v57 = vld [vmem:[%s5873_s19 + $0x88] sm:$0xff]  ;;  %v5687_v1 = vld [vmem:[%s5868_s14 + $0x1] ss:$0 sm:$0xff] }
 0x118   : > { %1956 = vmatpush.bf16.msra.mxu2 %v5390_v55  ;;  %v5690_v51 = vld [vmem:[%s5878_s24 + $0x1] ss:$0 sm:$0xff] }
 0x119   : > { %v1543_v63 = vmul.f32 %v5684_v58, %v1539_v61  ;;  %v5686_v61 = vld [vmem:[%s5868_s14] ss:$0 sm:$0xff] }
 0x11a   : > { %1941 = vmatpush.bf16.msra.mxu1 %v5383_v54  ;;  %v2066_v55 = vld [vmem:[%s5838_s17 + $0x40] sm:$0xff] }
 0x11b   : > { %v6139_v5 = vadd.f32 %v5685_v0, %v1543_v63 }
 0x11c   : > { %v1536_v4 = vpop.f32.mrf.mxu2 }
 0x11d   : > { %v1537_v6 = vadd.f32 %v1536_v4, %v1523_v3  ;;  %v1552_v10 = vrot.slane %v6139_v5, 7  ;;  %v5688_v4 = vld [vmem:[%s5868_s14 + $0x2] ss:$0 sm:$0xff] }
 0x11f   : > { %v1540_v8 = vmax.f32 %v1537_v6, 0.0  ;;  %v6149_v14 = vsel %vm1551_vm8, 0.0, %v1552_v10 }
 0x120   : > { %v1568_v18 = vrot.slane %v6149_v14, 2 }
 0x121   : > { %v1544_v9 = vmul.f32 %v5684_v58, %v1540_v8  ;;  %v5382_v58 = vld [vmem:[%s5873_s19] sm:$0xff] }
 0x122   : > { %1942 = vmatpush.bf16.msra.mxu1 %v5382_v58 }
 0x123   : > { %v6143_v11 = vadd.f32 %v5685_v0, %v1544_v9 }
 0x125   : > { %v1553_v12 = vrot.slane %v6143_v11, 7  ;;  %v5648_v13 = vpack.i.bf16 %v6143_v11, %v6139_v5 }
 0x126   : > { %2074 = vmatpush.msrb.mxu1 %v2073_v37  ;;  %v2022_v37 = vld [vmem:[%s5833_s13] sm:$0xff] }
 0x127   : > { %v1559_v15 = vsel %vm1551_vm8, %v1553_v12, 0.0  ;;  %5649 = vrot.lane.b32.xlu0 %v5648_v13, %s6601_s1  ;;  %v6154_v16 = vsel %vm1551_vm8, %v1552_v10, %v1553_v12 }
 0x128   : > { %v1571_v17 = vrot.slane %v1559_v15, 2  ;;  %v1569_v19 = vrot.slane %v6154_v16, 2  ;;  %2075 = vmatpush.msrb.mxu1 %v2072_v39  ;;  %v5417_v39 = vld [vmem:[%s5883_s30 + $0x58] sm:$0xff] }
 0x12a   : > { %v6159_v20 = vsel %vm953_vm1, %v1568_v18, %v1569_v19  ;;  %v6162_v21 = vsel %vm953_vm1, %v1569_v19, %v1571_v17  ;;  %2076 = vmatpush.msrb.mxu1 %v2071_v40  ;;  %v5478_v17 = vld [vmem:[%s6647_s11 + $0x60] sm:$0xff] }
 0x12b   : > { %v5658_v22 = vpack.i.bf16 %v6162_v21, %v6159_v20  ;;  %v1579_v34 = vpack.c.bf16 %v6162_v21, %v6159_v20 }
 0x199   : > { %v5650_v28 = vpop.permute.xlu0 %5649 }
 0x19a   : > { %v5652_v29 = vunpack.i.h.bf16 %v5650_v28  ;;  %v5651_v30 = vunpack.i.l.bf16 %v5650_v28 }
 0x19c   : > { %v1576_v31 = vsel %vm1575_vm9, %v6149_v14, %v5651_v30  ;;  %v1577_v32 = vsel %vm1575_vm9, %v6154_v16, %v5652_v29 }
 0x19d   : > { %v1578_v33 = vpack.c.bf16 %v1577_v32, %v1576_v31 }
 0x19f   : > { %1689 = vmatmul.bf16.vlgmr.msrb.gmra.mxu3 %v1578_v33 }
 0x1a0   : > { %1963 = vmatpush.bf16.msrb.mxu3 %v5405_v38 }
 0x1a4   : > { %1964 = vmatpush.bf16.msrb.mxu3 %v5404_v41 }
 0x1a8   : > { %1965 = vmatpush.bf16.msrb.mxu3 %v5403_v44  ;;  %v2070_v44 = vld [vmem:[%s5838_s17 + $0x60] sm:$0xff] }
 0x1a9   : > { %2077 = vmatpush.msrb.mxu1 %v2070_v44  ;;  %v5413_v44 = vld [vmem:[%s5883_s30 + $0x38] sm:$0xff] }
 0x1aa   : > { %2213 = vmatpush.bf16.msrb.mxu2 %v5413_v44  ;;  %v5454_v44 = vld [vmem:[%s5903_s27 + $0x60] sm:$0xff] }
 0x1ab   : > { %2078 = vmatpush.msrb.mxu1 %v2069_v46  ;;  %v5411_v46 = vld [vmem:[%s5883_s30 + $0x28] sm:$0xff] }
 0x1ac   : > { %1966 = vmatpush.bf16.msrb.mxu3 %v5402_v47 }
 0x1ad   : > { %2079 = vmatpush.msrb.mxu1 %v2068_v49  ;;  %v5408_v49 = vld [vmem:[%s5883_s30 + $0x10] sm:$0xff] }
 0x1af   : > { %4513 = vmatmul.msk.bf16.vlgmr.msra.gmra.mxu3 %vm1575_vm9, %v1579_v34  ;;  %v5689_v34 = vld [vmem:[%s5878_s24] ss:$0 sm:$0xff]  ;;  %2080 = vmatpush.msrb.mxu1 %v2067_v52 }
 0x1b0   : > { %1967 = vmatpush.bf16.msrb.mxu3 %v5401_v50 }
 0x1b1   : > { %2081 = vmatpush.msrb.mxu1 %v2066_v55 }
 0x1b4   : > { %1968 = vmatpush.bf16.msrb.mxu3 %v5400_v53 }
 0x1b8   : > { %1969 = vmatpush.bf16.msrb.mxu3 %v5399_v57  ;;  %v5691_v57 = vld [vmem:[%s5878_s24 + $0x2] ss:$0 sm:$0xff] }
 0x1bc   : > { %1970 = vmatpush.bf16.msrb.mxu3 %v5398_v59  ;;  %v2065_v59 = vld [vmem:[%s5838_s17 + $0x38] sm:$0xff] }
 0x1bd   : > { %2082 = vmatpush.msrb.mxu1 %v2065_v59 }
 0x1c0   : > { %2230 = vmatpush.bf16.msra.mxu3 %v5417_v39  ;;  %v5456_v39 = vld [vmem:[%s5903_s27 + $0x70] sm:$0xff] }
 0x222   : > { %v1690_v56 = vpop.f32.mrf.mxu3 }
 0x223   : > { %v1691_v62 = vadd.f32 %v5686_v61, %v1690_v56 }
 0x22a   : > { %v1692_v60 = vpop.f32.mrf.mxu3 }
 0x22b   : > { %v1693_v6 = vadd.f32 %v5686_v61, %v1692_v60  ;;  %v2064_v61 = vld [vmem:[%s5838_s17 + $0x30] sm:$0xff] }
 0x22c   : > { %2083 = vmatpush.msrb.mxu1 %v2064_v61 }
 0x232   : > { %v1704_v63 = vpop.f32.mrf.mxu3 }
 0x233   : > { %v1705_v0 = vadd.f32 %v1704_v63, %v1691_v62 }
 0x235   : > { %v1709_v2 = vmax.f32 %v1705_v0, 0.0  ;;  %v2063_v0 = vld [vmem:[%s5838_s17 + $0x28] sm:$0xff] }
 0x236   : > { %2084 = vmatpush.msrb.mxu1 %v2063_v0 }
 0x237   : > { %v1713_v3 = vmul.f32 %v5687_v1, %v1709_v2  ;;  %v2062_v2 = vld [vmem:[%s5838_s17 + $0x20] sm:$0xff] }
 0x238   : > { %2085 = vmatpush.msrb.mxu1 %v2062_v2  ;;  %v5425_v2 = vld [vmem:[%s6635_s12 + $0x38] sm:$0xff] }
 0x239   : > { %v1717_v8 = vadd.f32 %v5688_v4, %v1713_v3 }
 0x23a   : > { %v1706_v7 = vpop.f32.mrf.mxu3 }
 0x23b   : > { %v1707_v9 = vadd.f32 %v1706_v7, %v1693_v6  ;;  %v1721_v12 = vrot.slane %v1717_v8, 7  ;;  %v2061_v6 = vld [vmem:[%s5838_s17 + $0x18] sm:$0xff] }
 0x23c   : > { %2086 = vmatpush.msrb.mxu1 %v2061_v6  ;;  %v5432_v6 = vld [vmem:[%s6635_s12 + $0x70] sm:$0xff] }
 0x23d   : > { %v1710_v10 = vmax.f32 %v1707_v9, 0.0  ;;  %v1727_v18 = vsel %vm1551_vm8, 0.0, %v1721_v12 }
 0x23e   : > { %v1731_v27 = vrot.slane %v1727_v18, 2  ;;  %v2037_v18 = vld [vmem:[%s5833_s13 + $0x78] sm:$0xff] }
 0x23f   : > { %v1714_v13 = vmul.f32 %v5687_v1, %v1710_v10  ;;  %v2060_v10 = vld [vmem:[%s5838_s17 + $0x10] sm:$0xff] }
 0x240   : > { %2087 = vmatpush.msrb.mxu1 %v2060_v10  ;;  %v5423_v10 = vld [vmem:[%s6635_s12 + $0x28] sm:$0xff] }
 0x241   : > { %v1718_v15 = vadd.f32 %v5688_v4, %v1714_v13  ;;  %v1997_v13 = vld [vmem:[%s6646_s9] sm:$0xff] }
 0x243   : > { %v1722_v19 = vrot.slane %v1718_v15, 7  ;;  %v1739_v23 = vpack.c.bf16 %v1718_v15, %v1717_v8  ;;  %v2059_v15 = vld [vmem:[%s5838_s17 + $0x8] sm:$0xff] }
 0x244   : > { %2088 = vmatpush.msrb.mxu1 %v2059_v15  ;;  %v5422_v15 = vld [vmem:[%s6635_s12 + $0x20] sm:$0xff] }
 0x245   : > { %v1723_v25 = vsel %vm1551_vm8, %v1721_v12, %v1722_v19  ;;  %v1728_v26 = vsel %vm1551_vm8, %v1722_v19, 0.0  ;;  %1957 = vmatmul.bf16.vlgmr.msra.gmra.mxu2 %v1739_v23  ;;  %v2036_v19 = vld [vmem:[%s5833_s13 + $0x70] sm:$0xff]  ;;  %v2035_v23 = vld [vmem:[%s5833_s13 + $0x68] sm:$0xff] }
 0x246   : > { %v1732_v28 = vrot.slane %v1723_v25, 2  ;;  %v1734_v29 = vrot.slane %v1728_v26, 2  ;;  %v4612_v30 = vpack.c.bf16 %v1723_v25, %v1721_v12  ;;  %v2034_v25 = vld [vmem:[%s5833_s13 + $0x60] sm:$0xff]  ;;  %v2033_v26 = vld [vmem:[%s5833_s13 + $0x58] sm:$0xff] }
 0x248   : > { %4613 = vmatmul.msk.bf16.vlgmr.msra.gmra.mxu1 %vm6214_vm11, %v4612_v30  ;;  %v1733_v31 = vsel %vm953_vm1, %v1731_v27, %v1732_v28  ;;  %v1735_v32 = vsel %vm953_vm1, %v1732_v28, %v1734_v29  ;;  %v2032_v27 = vld [vmem:[%s5833_s13 + $0x50] sm:$0xff]  ;;  %v2031_v28 = vld [vmem:[%s5833_s13 + $0x48] sm:$0xff]  ;;  %v2030_v29 = vld [vmem:[%s5833_s13 + $0x40] sm:$0xff] }
 0x249   : > { %v1740_v33 = vpack.c.bf16 %v1735_v32, %v1733_v31  ;;  %v2029_v30 = vld [vmem:[%s5833_s13 + $0x38] sm:$0xff]  ;;  %v2028_v31 = vld [vmem:[%s5833_s13 + $0x30] sm:$0xff]  ;;  %v2027_v32 = vld [vmem:[%s5833_s13 + $0x28] sm:$0xff] }
 0x24b   : > { %1971 = vmatmul.bf16.vlgmr.msrb.gmra.mxu3 %v1740_v33  ;;  %v2026_v33 = vld [vmem:[%s5833_s13 + $0x20] sm:$0xff] }
 0x2c5   : > { %v1944_v35 = vpop.f32.mrf.mxu1 }
 0x2c6   : > { %v1945_v38 = vadd.f32 %v5689_v34, %v1944_v35  ;;  %v2024_v35 = vld [vmem:[%s5833_s13 + $0x10] sm:$0xff] }
 0x2c8   : > { %v1958_v36 = vpop.f32.mrf.mxu2 }
 0x2c9   : > { %v1959_v41 = vadd.f32 %v1958_v36, %v1945_v38  ;;  %v2023_v36 = vld [vmem:[%s5833_s13 + $0x8] sm:$0xff]  ;;  %v2058_v38 = vld [vmem:[%s5838_s17] sm:$0xff] }
 0x2ca   : > { %2089 = vmatpush.msrb.mxu1 %v2058_v38  ;;  %v5449_v38 = vld [vmem:[%s5903_s27 + $0x38] sm:$0xff] }
 0x2cd   : > { %v1946_v42 = vpop.f32.mrf.mxu1 }
 0x2ce   : > { %v1972_v43 = vpop.f32.mrf.mxu3  ;;  %v1947_v47 = vadd.f32 %v5689_v34, %v1946_v42  ;;  %v2025_v34 = vld [vmem:[%s5833_s13 + $0x18] sm:$0xff]  ;;  %v5415_v42 = vld [vmem:[%s5883_s30 + $0x48] sm:$0xff] }
 0x2cf   : > { %v1973_v45 = vadd.f32 %v1972_v43, %v1959_v41  ;;  %v5416_v41 = vld [vmem:[%s5883_s30 + $0x50] sm:$0xff]  ;;  %v5414_v43 = vld [vmem:[%s5883_s30 + $0x40] sm:$0xff] }
 0x2d0   : > { %v1960_v48 = vpop.f32.mrf.mxu2  ;;  %2231 = vmatpush.bf16.msra.mxu3 %v5416_v41  ;;  %v5448_v41 = vld [vmem:[%s5903_s27 + $0x30] sm:$0xff] }
 0x2d1   : > { %v1977_v50 = vmax.f32 %v1973_v45, 0.0  ;;  %v1961_v53 = vadd.f32 %v1960_v48, %v1947_v47  ;;  %v5412_v45 = vld [vmem:[%s5883_s30 + $0x30] sm:$0xff]  ;;  %v5410_v47 = vld [vmem:[%s5883_s30 + $0x20] sm:$0xff]  ;;  %v5409_v48 = vld [vmem:[%s5883_s30 + $0x18] sm:$0xff] }
 0x2d2   : > { %2214 = vmatpush.bf16.msrb.mxu2 %v5412_v45 }
 0x2d3   : > { %v1981_v56 = vmul.f32 %v5690_v51, %v1977_v50 }
 0x2d4   : > { %2232 = vmatpush.bf16.msra.mxu3 %v5415_v42  ;;  %v5455_v42 = vld [vmem:[%s5903_s27 + $0x68] sm:$0xff] }
 0x2d5   : > { %v1985_v62 = vadd.f32 %v5691_v57, %v1981_v56 }
 0x2d6   : > { %v1974_v54 = vpop.f32.mrf.mxu3  ;;  %2215 = vmatpush.bf16.msrb.mxu2 %v5411_v46 }
 0x2d7   : > { %v1975_v58 = vadd.f32 %v1974_v54, %v1961_v53  ;;  %v1989_v3 = vrot.slane %v1985_v62, 1  ;;  %v5407_v53 = vld [vmem:[%s5883_s30 + $0x8] sm:$0xff] }
 0x2d8   : > { %2233 = vmatpush.bf16.msra.mxu3 %v5414_v43  ;;  %v5692_v43 = vld [vmem:[%s6637_s6] ss:$0 sm:$0xff] }
 0x2d9   : > { %v1978_v60 = vmax.f32 %v1975_v58, 0.0 }
 0x2da   : > { %2216 = vmatpush.bf16.msrb.mxu2 %v5410_v47  ;;  %v5453_v47 = vld [vmem:[%s5903_s27 + $0x58] sm:$0xff] }
 0x2db   : > { %v1982_v63 = vmul.f32 %v5690_v51, %v1978_v60 }
 0x2dc   : > { %2454 = vmatpush.bf16.msrb.mxu3 %v5425_v2  ;;  %v5447_v2 = vld [vmem:[%s5903_s27 + $0x28] sm:$0xff] }
 0x2dd   : > { %v1986_v1 = vadd.f32 %v5691_v57, %v1982_v63 }
 0x2de   : > { %2217 = vmatpush.bf16.msrb.mxu2 %v5409_v48 }
 0x2df   : > { %v1990_v4 = vrot.slane %v1986_v1, 1 }
 0x2e1   : > { %v1994_v7 = vsel %vm945_vm2, %v1990_v4, 0.0  ;;  %v1991_v8 = vsel %vm945_vm2, %v1989_v3, %v1990_v4  ;;  %v5441_v4 = vld [vmem:[%s6635_s12 + $0xb8] sm:$0xff] }
 0x2e2   : > { %v1996_v9 = vmax.f32 %v1986_v1, %v1994_v7  ;;  %v1995_v12 = vmax.f32 %v1985_v62, %v1991_v8  ;;  %2218 = vmatpush.bf16.msrb.mxu2 %v5408_v49  ;;  %v5406_v62 = vld [vmem:[%s5883_s30] sm:$0xff]  ;;  %v5433_v1 = vld [vmem:[%s6635_s12 + $0x78] sm:$0xff]  ;;  %v5424_v7 = vld [vmem:[%s6635_s12 + $0x30] sm:$0xff]  ;;  %2480 = vmatpush.bf16.msra.mxu1 %v5441_v4 }
 0x2e3   : > { %v5440_v8 = vld [vmem:[%s6635_s12 + $0xb0] sm:$0xff]  ;;  %2455 = vmatpush.bf16.msrb.mxu3 %v5424_v7  ;;  %v5693_v49 = vld [vmem:[%s6637_s6 + $0x1] ss:$0 sm:$0xff]  ;;  %v5451_v4 = vld [vmem:[%s5903_s27 + $0x48] sm:$0xff] }
 0x2e4   : > { %2016 = vmatpush.msra.mxu0 %v1996_v9  ;;  %v5431_v9 = vld [vmem:[%s6635_s12 + $0x68] sm:$0xff] }
 0x2e5   : > { %v5463_v7 = vld [vmem:[%s5903_s27 + $0xa8] sm:$0xff] }
 0x2e6   : > { %2017 = vmatpush.msra.mxu0 %v1995_v12  ;;  %2219 = vmatpush.bf16.msrb.mxu2 %v5407_v53  ;;  %v5439_v12 = vld [vmem:[%s6635_s12 + $0xa8] sm:$0xff]  ;;  %v5452_v53 = vld [vmem:[%s5903_s27 + $0x50] sm:$0xff] }
 0x2e7   : > { %4614 = vmatmul.msk.f32.vlgmr.msra.gmra.mxu0 %vm1998_vm12, %v1997_v13  ;;  %2481 = vmatpush.bf16.msra.mxu1 %v5440_v8  ;;  %v5430_v13 = vld [vmem:[%s6635_s12 + $0x60] sm:$0xff] }
 0x2e8   : > { %2038 = vmatpush.msrb.mxu0 %v2037_v18  ;;  %2456 = vmatpush.bf16.msrb.mxu3 %v5423_v10  ;;  %v5429_v18 = vld [vmem:[%s6635_s12 + $0x58] sm:$0xff]  ;;  %v5450_v8 = vld [vmem:[%s5903_s27 + $0x40] sm:$0xff] }
 0x2e9   : > { %v5445_v10 = vld [vmem:[%s5903_s27 + $0x18] sm:$0xff] }
 0x2ea   : > { %2039 = vmatpush.msrb.mxu0 %v2036_v19  ;;  %2220 = vmatpush.bf16.msrb.mxu2 %v5406_v62 }
 0x2eb   : > { %2482 = vmatpush.bf16.msra.mxu1 %v5439_v12  ;;  %v5462_v12 = vld [vmem:[%s5903_s27 + $0xa0] sm:$0xff] }
 0x2ec   : > { %2040 = vmatpush.msrb.mxu0 %v2035_v23  ;;  %2457 = vmatpush.bf16.msrb.mxu3 %v5422_v15  ;;  %v5444_v15 = vld [vmem:[%s5903_s27 + $0x10] sm:$0xff] }
 0x2ee   : > { %2041 = vmatpush.msrb.mxu0 %v2034_v25  ;;  %v5421_v25 = vld [vmem:[%s6635_s12 + $0x18] sm:$0xff]  ;;  %2708 = vmatpush.bf16.msra.mxu2 %v5449_v38 }
 0x2f0   : > { %2042 = vmatpush.msrb.mxu0 %v2033_v26  ;;  %v5438_v26 = vld [vmem:[%s6635_s12 + $0xa0] sm:$0xff]  ;;  %2458 = vmatpush.bf16.msrb.mxu3 %v5421_v25  ;;  %v5460_v25 = vld [vmem:[%s5903_s27 + $0x90] sm:$0xff] }
 0x2f1   : > { %2483 = vmatpush.bf16.msra.mxu1 %v5438_v26  ;;  %v5486_v26 = vld [vmem:[%s6647_s11 + $0xa0] sm:$0xff] }
 0x2f2   : > { %2043 = vmatpush.msrb.mxu0 %v2032_v27  ;;  %v5428_v27 = vld [vmem:[%s6635_s12 + $0x50] sm:$0xff]  ;;  %2709 = vmatpush.bf16.msra.mxu2 %v5448_v41 }
 0x2f3   : > { %v5480_v41 = vld [vmem:[%s6647_s11 + $0x70] sm:$0xff] }
 0x2f4   : > { %2044 = vmatpush.msrb.mxu0 %v2031_v28  ;;  %v5420_v28 = vld [vmem:[%s6635_s12 + $0x10] sm:$0xff] }
 0x2f5   : > { %2459 = vmatpush.bf16.msrb.mxu3 %v5420_v28  ;;  %v5459_v28 = vld [vmem:[%s5903_s27 + $0x88] sm:$0xff] }
 0x2f6   : > { %2045 = vmatpush.msrb.mxu0 %v2030_v29  ;;  %v5437_v29 = vld [vmem:[%s6635_s12 + $0x98] sm:$0xff]  ;;  %2710 = vmatpush.bf16.msra.mxu2 %v5447_v2 }
 0x2f7   : > { %2484 = vmatpush.bf16.msra.mxu1 %v5437_v29  ;;  %v5485_v29 = vld [vmem:[%s6647_s11 + $0x98] sm:$0xff] }
 0x2f8   : > { %2046 = vmatpush.msrb.mxu0 %v2029_v30  ;;  %v5427_v30 = vld [vmem:[%s6635_s12 + $0x48] sm:$0xff]  ;;  %v5477_v2 = vld [vmem:[%s6647_s11 + $0x58] sm:$0xff] }
 0x2fa   : > { %2047 = vmatpush.msrb.mxu0 %v2028_v31  ;;  %v5419_v31 = vld [vmem:[%s6635_s12 + $0x8] sm:$0xff] }
 0x2fb   : > { %2460 = vmatpush.bf16.msrb.mxu3 %v5419_v31  ;;  %v5484_v31 = vld [vmem:[%s6647_s11 + $0x90] sm:$0xff] }
 0x2fc   : > { %2048 = vmatpush.msrb.mxu0 %v2027_v32  ;;  %v5436_v32 = vld [vmem:[%s6635_s12 + $0x90] sm:$0xff] }
 0x2fd   : > { %2485 = vmatpush.bf16.msra.mxu1 %v5436_v32  ;;  %v5483_v32 = vld [vmem:[%s6647_s11 + $0x88] sm:$0xff] }
 0x2fe   : > { %2049 = vmatpush.msrb.mxu0 %v2026_v33  ;;  %v5426_v33 = vld [vmem:[%s6635_s12 + $0x40] sm:$0xff] }
 0x300   : > { %2050 = vmatpush.msrb.mxu0 %v2025_v34  ;;  %v5418_v34 = vld [vmem:[%s6635_s12] sm:$0xff] }
 0x301   : > { %2461 = vmatpush.bf16.msrb.mxu3 %v5418_v34  ;;  %v5482_v34 = vld [vmem:[%s6647_s11 + $0x80] sm:$0xff] }
 0x302   : > { %2051 = vmatpush.msrb.mxu0 %v2024_v35  ;;  %v5435_v35 = vld [vmem:[%s6635_s12 + $0x88] sm:$0xff] }
 0x303   : > { %2486 = vmatpush.bf16.msra.mxu1 %v5435_v35  ;;  %v5695_v35 = vld [vmem:[%s6648_s23] ss:$0 sm:$0xff] }
 0x304   : > { %2052 = vmatpush.msrb.mxu0 %v2023_v36  ;;  %v5434_v36 = vld [vmem:[%s6635_s12 + $0x80] sm:$0xff] }
 0x306   : > { %2053 = vmatpush.msrb.mxu0 %v2022_v37  ;;  %v5457_v37 = vld [vmem:[%s5903_s27 + $0x78] sm:$0xff] }
 0x307   : > { %2487 = vmatpush.bf16.msra.mxu1 %v5434_v36 }
 0x308   : > { %2467 = vmatpush.bf16.msra.mxu0 %v5433_v1 }
 0x30c   : > { %2468 = vmatpush.bf16.msra.mxu0 %v5432_v6  ;;  %v5446_v6 = vld [vmem:[%s5903_s27 + $0x20] sm:$0xff] }
 0x30d   : > { %2711 = vmatpush.bf16.msra.mxu2 %v5446_v6  ;;  %v5474_v6 = vld [vmem:[%s6647_s11 + $0x40] sm:$0xff] }
 0x310   : > { %2469 = vmatpush.bf16.msra.mxu0 %v5431_v9  ;;  %v5489_v9 = vld [vmem:[%s6647_s11 + $0xb8] sm:$0xff] }
 0x311   : > { %2712 = vmatpush.bf16.msra.mxu2 %v5445_v10 }
 0x314   : > { %2470 = vmatpush.bf16.msra.mxu0 %v5430_v13  ;;  %v5488_v13 = vld [vmem:[%s6647_s11 + $0xb0] sm:$0xff] }
 0x315   : > { %2713 = vmatpush.bf16.msra.mxu2 %v5444_v15  ;;  %v5470_v15 = vld [vmem:[%s6647_s11 + $0x20] sm:$0xff] }
 0x318   : > { %2471 = vmatpush.bf16.msra.mxu0 %v5429_v18  ;;  %v5461_v18 = vld [vmem:[%s5903_s27 + $0x98] sm:$0xff] }
 0x31c   : > { %2472 = vmatpush.bf16.msra.mxu0 %v5428_v27  ;;  %v5442_v27 = vld [vmem:[%s5903_s27] sm:$0xff] }
 0x320   : > { %2473 = vmatpush.bf16.msra.mxu0 %v5427_v30  ;;  %v5458_v30 = vld [vmem:[%s5903_s27 + $0x80] sm:$0xff] }
 0x324   : > { %2474 = vmatpush.bf16.msra.mxu0 %v5426_v33 }
 0x364   : > { %v2019_v40 = vpop.f32.mrf.mxu0 }
 0x365   : > { %2054 = vmatmul.f32.vlgmr.msrb.gmra.mxu0 %v2019_v40  ;;  %2090 = vmatmul.f32.vlgmr.msrb.gmra.mxu1 %v2019_v40  ;;  %v5465_v40 = vld [vmem:[%s5903_s27 + $0xb8] sm:$0xff] }
 0x366   : > { %2734 = vmatpush.bf16.msrb.mxu0 %v5465_v40 }
 0x3e2   : > { %v2055_v50 = vpop.f32.mrf.mxu0  ;;  %v2091_v51 = vpop.f32.mrf.mxu1 }
 0x3e3   : > { %v6272_v52 = vmax.f32 %v2055_v50, %v2091_v51  ;;  %v5694_v51 = vld [vmem:[%s6637_s6 + $0x2] ss:$0 sm:$0xff]  ;;  %s6652_s6 = sld [smem:[#allocation8_spill]] }
 0x3e5   : > { %v2096_v54 = vrot.slane %v6272_v52, 7  ;;  %2100 = vrot.lane.b32.xlu0 %v6272_v52, %s6601_s1 }
 0x3e7   : > { %v2099_v55 = vsel %vm1551_vm8, %v2096_v54, 0.0  ;;  %v2098_v56 = vsel %vm1551_vm8, 0.0, %v2096_v54 }
 0x3e8   : > { %v2105_v57 = vrot.slane %v2098_v56, 2  ;;  %v2106_v58 = vrot.slane %v2099_v55, 2 }
 0x3ea   : > { %v2107_v59 = vsel %vm953_vm1, %v2105_v57, %v2106_v58 }
 0x3eb   : > { %v5653_v60 = vpack.i.bf16 %v2107_v59, %v2098_v56  ;;  %v2111_v61 = vpack.c.bf16 %v2107_v59, %v2107_v59 }
 0x3ed   : > { %5654 = vrot.lane.b32.xlu1 %v5653_v60, %s6601_s1  ;;  %4663 = vmatmul.msk.bf16.vlgmr.msra.gmra.mxu3 %vm1575_vm9, %v2111_v61 }
 0x3ee   : > { %2721 = vmatpush.bf16.msra.mxu3 %v5457_v37  ;;  %v5481_v37 = vld [vmem:[%s6647_s11 + $0x78] sm:$0xff] }
 0x3f2   : > { %2722 = vmatpush.bf16.msra.mxu3 %v5456_v39 }
 0x3f6   : > { %2723 = vmatpush.bf16.msra.mxu3 %v5455_v42 }
 0x3fa   : > { %2724 = vmatpush.bf16.msra.mxu3 %v5454_v44  ;;  %v5696_v44 = vld [vmem:[%s6648_s23 + $0x1] ss:$0 sm:$0xff] }
 0x3fe   : > { %2725 = vmatpush.bf16.msra.mxu3 %v5453_v47  ;;  %v5697_v47 = vld [vmem:[%s6648_s23 + $0x2] ss:$0 sm:$0xff] }
 0x402   : > { %2726 = vmatpush.bf16.msra.mxu3 %v5452_v53 }
 0x406   : > { %2727 = vmatpush.bf16.msra.mxu3 %v5451_v4  ;;  %v5475_v4 = vld [vmem:[%s6647_s11 + $0x48] sm:$0xff] }
 0x40a   : > { %2728 = vmatpush.bf16.msra.mxu3 %v5450_v8  ;;  %v5471_v8 = vld [vmem:[%s6647_s11 + $0x28] sm:$0xff] }
 0x457   : > { %v2101_v63 = vpop.permute.xlu0 %2100 }
 0x458   : > { %v2109_v0 = vsel %vm1575_vm9, %v2098_v56, %v2101_v63 }
 0x459   : > { %v2110_v3 = vpack.c.bf16 %v2109_v0, %v2109_v0 }
 0x45b   : > { %2221 = vmatmul.bf16.vlgmr.msrb.gmra.mxu2 %v2110_v3  ;;  %v5464_v3 = vld [vmem:[%s5903_s27 + $0xb0] sm:$0xff] }
 0x45c   : > { %2735 = vmatpush.bf16.msrb.mxu0 %v5464_v3  ;;  %v5476_v3 = vld [vmem:[%s6647_s11 + $0x50] sm:$0xff] }
 0x460   : > { %2736 = vmatpush.bf16.msrb.mxu0 %v5463_v7  ;;  %v5472_v7 = vld [vmem:[%s6647_s11 + $0x30] sm:$0xff] }
 0x464   : > { %2737 = vmatpush.bf16.msrb.mxu0 %v5462_v12 }
 0x468   : > { %2738 = vmatpush.bf16.msrb.mxu0 %v5461_v18 }
 0x46c   : > { %2739 = vmatpush.bf16.msrb.mxu0 %v5460_v25 }
 0x470   : > { %v2235_v19 = vpop.f32.mrf.mxu3  ;;  %2740 = vmatpush.bf16.msrb.mxu0 %v5459_v28 }
 0x474   : > { %2741 = vmatpush.bf16.msrb.mxu0 %v5458_v30  ;;  %v5700_v30 = vld [vmem:[%s6649_s28 + $0x2] ss:$0 sm:$0xff] }
 0x478   : > { %v2237_v23 = vpop.f32.mrf.mxu3 }
 0x479   : > { %v5443_v23 = vld [vmem:[%s5903_s27 + $0x8] sm:$0xff] }
 0x47a   : > { %2714 = vmatpush.bf16.msra.mxu2 %v5443_v23  ;;  %v5469_v23 = vld [vmem:[%s6647_s11 + $0x18] sm:$0xff] }
 0x47e   : > { %2715 = vmatpush.bf16.msra.mxu2 %v5442_v27 }
 0x482   : > { %2987 = vmatpush.bf16.msrb.mxu2 %v5481_v37 }
 0x486   : > { %2988 = vmatpush.bf16.msrb.mxu2 %v5480_v41 }
 0x4de   : > { %v2222_v45 = vpop.f32.mrf.mxu2 }
 0x4df   : > { %v2223_v46 = vadd.f32 %v5692_v43, %v2222_v45 }
 0x4e1   : > { %v2236_v48 = vadd.f32 %v2235_v19, %v2223_v46  ;;  %v5487_v19 = vld [vmem:[%s6647_s11 + $0xa8] sm:$0xff] }
 0x4e3   : > { %v2239_v50 = vmax.f32 %v2236_v48, 0.0 }
 0x4e5   : > { %v2242_v54 = vmul.f32 %v5693_v49, %v2239_v50 }
 0x4e6   : > { %v2224_v55 = vpop.f32.mrf.mxu2 }
 0x4e7   : > { %v2245_v56 = vadd.f32 %v5694_v51, %v2242_v54 }
 0x4e9   : > { %v2247_v57 = vrot.slane %v2245_v56, 7  ;;  %v2258_v58 = vpack.c.bf16 %v2245_v56, %v2245_v56 }
 0x4eb   : > { %2475 = vmatmul.bf16.vlgmr.msra.gmra.mxu0 %v2258_v58  ;;  %v4763_v59 = vpack.c.bf16 %v2247_v57, %v2247_v57  ;;  %v2249_v60 = vsel %vm1551_vm8, 0.0, %v2247_v57  ;;  %v2250_v61 = vsel %vm1551_vm8, %v2247_v57, 0.0 }
 0x4ec   : > { %v2253_v62 = vrot.slane %v2249_v60, 2  ;;  %v2254_v63 = vrot.slane %v2250_v61, 2  ;;  %v5655_v60 = vpop.permute.xlu1 %5654 }
 0x4ed   : > { %4764 = vmatmul.msk.bf16.vlgmr.msrb.gmra.mxu3 %vm4762_vm13, %v4763_v59 }
 0x4ee   : > { %v2255_v0 = vsel %vm953_vm1, %v2253_v62, %v2254_v63  ;;  %3000 = vmatpush.bf16.msrb.mxu3 %v5489_v9  ;;  %v5657_v62 = vunpack.i.h.bf16 %v5655_v60  ;;  %v5698_v9 = vld [vmem:[%s6649_s28] ss:$0 sm:$0xff] }
 0x4ef   : > { %v2259_v1 = vpack.c.bf16 %v2255_v0, %v2255_v0 }
 0x4f0   : > { %v2776_v63 = vsel %vm1575_vm9, %v6272_v52, %v5657_v62  ;;  %v5473_v52 = vld [vmem:[%s6647_s11 + $0x38] sm:$0xff] }
 0x4f1   : > { %2488 = vmatmul.bf16.vlgmr.msra.gmra.mxu1 %v2259_v1  ;;  %v2779_v0 = vpack.c.bf16 %v2776_v63, %v2776_v63  ;;  %v5479_v1 = vld [vmem:[%s6647_s11 + $0x68] sm:$0xff] }
 0x4f2   : > { %3001 = vmatpush.bf16.msrb.mxu3 %v5488_v13  ;;  %2989 = vmatpush.bf16.msrb.mxu2 %v5479_v1  ;;  %v5493_v1 = vld [vmem:[%s6650_s3 + $0x18] sm:$0xff] }
 0x4f3   : > { %2974 = vmatpush.bf16.msrb.mxu1 %v5473_v52 }
 0x4f6   : > { %3002 = vmatpush.bf16.msrb.mxu3 %v5487_v19  ;;  %2990 = vmatpush.bf16.msrb.mxu2 %v5478_v17 }
 0x4f7   : > { %2975 = vmatpush.bf16.msrb.mxu1 %v5472_v7 }
 0x4fa   : > { %3003 = vmatpush.bf16.msrb.mxu3 %v5486_v26  ;;  %2991 = vmatpush.bf16.msrb.mxu2 %v5477_v2  ;;  %v5699_v26 = vld [vmem:[%s6649_s28 + $0x1] ss:$0 sm:$0xff] }
 0x4fb   : > { %2976 = vmatpush.bf16.msrb.mxu1 %v5471_v8  ;;  %v5702_v2 = vld [vmem:[%s6651_s5 + $0x1] ss:$0 sm:$0xff] }
 0x4fe   : > { %3004 = vmatpush.bf16.msrb.mxu3 %v5485_v29  ;;  %2992 = vmatpush.bf16.msrb.mxu2 %v5476_v3 }
 0x4ff   : > { %2977 = vmatpush.bf16.msrb.mxu1 %v5470_v15 }
 0x502   : > { %3005 = vmatpush.bf16.msrb.mxu3 %v5484_v31  ;;  %2993 = vmatpush.bf16.msrb.mxu2 %v5475_v4  ;;  %v5703_v4 = vld [vmem:[%s6651_s5 + $0x2] ss:$0 sm:$0xff] }
 0x503   : > { %2978 = vmatpush.bf16.msrb.mxu1 %v5469_v23 }
 0x506   : > { %3006 = vmatpush.bf16.msrb.mxu3 %v5483_v32  ;;  %2994 = vmatpush.bf16.msrb.mxu2 %v5474_v6  ;;  %v5468_v32 = vld [vmem:[%s6647_s11 + $0x10] sm:$0xff] }
 0x507   : > { %2979 = vmatpush.bf16.msrb.mxu1 %v5468_v32  ;;  %v5492_v6 = vld [vmem:[%s6650_s3 + $0x10] sm:$0xff]  ;;  %v3176_v32 = vld [vmem:[%s6652_s6 + $0x18] sm:$0xff] }
 0x50a   : > { %3007 = vmatpush.bf16.msrb.mxu3 %v5482_v34 }
 0x568   : > { %v2476_v33 = vpop.f32.mrf.mxu0 }
 0x56e   : > { %v2489_v36 = vpop.f32.mrf.mxu1 }
 0x570   : > { %v2463_v38 = vpop.f32.mrf.mxu3  ;;  %v2478_v39 = vpop.f32.mrf.mxu0 }
 0x571   : > { %v2464_v40 = vadd.f32 %v5695_v35, %v2463_v38  ;;  %v5467_v35 = vld [vmem:[%s6647_s11 + $0x8] sm:$0xff] }
 0x572   : > { %2980 = vmatpush.bf16.msrb.mxu1 %v5467_v35  ;;  %v3173_v35 = vld [vmem:[%s6652_s6] sm:$0xff] }
 0x573   : > { %v2477_v42 = vadd.f32 %v2476_v33, %v2464_v40 }
 0x575   : > { %v2490_v43 = vadd.f32 %v2489_v36, %v2477_v42  ;;  %v5656_v42 = vunpack.i.l.bf16 %v5655_v60  ;;  %v5701_v60 = vld [vmem:[%s6651_s5] ss:$0 sm:$0xff]  ;;  %s6653_s5 = sld [smem:[#allocation18_spill]] }
 0x576   : > { %v2491_v45 = vpop.f32.mrf.mxu1 }
 0x577   : > { %v2493_v46 = vmax.f32 %v2490_v43, 0.0 }
 0x578   : > { %v2465_v48 = vpop.f32.mrf.mxu3 }
 0x579   : > { %v2496_v49 = vmul.f32 %v5696_v44, %v2493_v46  ;;  %v5668_v44 = vpack.i.bf16 %v6154_v16, %v6149_v14  ;;  %v5466_v48 = vld [vmem:[%s6647_s11] sm:$0xff] }
 0x57a   : > { %2981 = vmatpush.bf16.msrb.mxu1 %v5466_v48 }
 0x57b   : > { %v2499_v50 = vadd.f32 %v5697_v47, %v2496_v49 }
 0x57d   : > { %v2501_v51 = vrot.slane %v2499_v50, 7  ;;  %v2512_v53 = vpack.c.bf16 %v2499_v50, %v2499_v50 }
 0x57f   : > { %2729 = vmatmul.bf16.vlgmr.msra.gmra.mxu3 %v2512_v53  ;;  %v4864_v54 = vpack.c.bf16 %v2501_v51, %v2501_v51  ;;  %v2503_v55 = vsel %vm1551_vm8, 0.0, %v2501_v51  ;;  %v2504_v56 = vsel %vm1551_vm8, %v2501_v51, 0.0  ;;  %v5501_v53 = vld [vmem:[%s6650_s3 + $0x58] sm:$0xff] }
 0x580   : > { %v2507_v57 = vrot.slane %v2503_v55, 2  ;;  %v2508_v58 = vrot.slane %v2504_v56, 2  ;;  %3155 = vmatpush.bf16.msra.mxu1 %v5501_v53  ;;  %v5499_v55 = vld [vmem:[%s6650_s3 + $0x48] sm:$0xff]  ;;  %v5498_v56 = vld [vmem:[%s6650_s3 + $0x40] sm:$0xff] }
 0x581   : > { %4865 = vmatmul.msk.bf16.vlgmr.msra.gmra.mxu2 %vm4762_vm13, %v4864_v54  ;;  %v5500_v54 = vld [vmem:[%s6650_s3 + $0x50] sm:$0xff] }
 0x582   : > { %v2509_v59 = vsel %vm953_vm1, %v2507_v57, %v2508_v58  ;;  %v5497_v57 = vld [vmem:[%s6650_s3 + $0x38] sm:$0xff]  ;;  %v5496_v58 = vld [vmem:[%s6650_s3 + $0x30] sm:$0xff] }
 0x583   : > { %v2513_v61 = vpack.c.bf16 %v2509_v59, %v2509_v59  ;;  %3138 = vmatpush.bf16.msra.mxu0 %v5497_v57  ;;  %v5495_v59 = vld [vmem:[%s6650_s3 + $0x28] sm:$0xff] }
 0x584   : > { %3156 = vmatpush.bf16.msra.mxu1 %v5500_v54 }
 0x585   : > { %2742 = vmatmul.bf16.vlgmr.msrb.gmra.mxu0 %v2513_v61  ;;  %v5494_v61 = vld [vmem:[%s6650_s3 + $0x20] sm:$0xff] }
 0x587   : > { %3139 = vmatpush.bf16.msra.mxu0 %v5496_v58 }
 0x588   : > { %3157 = vmatpush.bf16.msra.mxu1 %v5499_v55 }
 0x58b   : > { %3140 = vmatpush.bf16.msra.mxu0 %v5495_v59 }
 0x58c   : > { %3158 = vmatpush.bf16.msra.mxu1 %v5498_v56 }
 0x58f   : > { %3008 = vmatmul.bf16.vlgmr.msrb.gmra.mxu3 %v2779_v0  ;;  %3141 = vmatpush.bf16.msra.mxu0 %v5494_v61 }
 0x593   : > { %3142 = vmatpush.bf16.msra.mxu0 %v5493_v1 }
 0x597   : > { %3143 = vmatpush.bf16.msra.mxu0 %v5492_v6 }
 0x602   : > { %v2730_v10 = vpop.f32.mrf.mxu3  ;;  %v2743_v12 = vpop.f32.mrf.mxu0 }
 0x604   : > { %v2717_v13 = vpop.f32.mrf.mxu2 }
 0x605   : > { %v2718_v18 = vadd.f32 %v5698_v9, %v2717_v13  ;;  %v5491_v9 = vld [vmem:[%s6650_s3 + $0x8] sm:$0xff] }
 0x606   : > { %3144 = vmatpush.bf16.msra.mxu0 %v5491_v9 }
 0x607   : > { %v2731_v19 = vadd.f32 %v2730_v10, %v2718_v18 }
 0x609   : > { %v2744_v25 = vadd.f32 %v2743_v12, %v2731_v19 }
 0x60a   : > { %v2732_v27 = vpop.f32.mrf.mxu3  ;;  %v2745_v28 = vpop.f32.mrf.mxu0 }
 0x60b   : > { %v2747_v29 = vmax.f32 %v2744_v25, 0.0  ;;  %v5490_v25 = vld [vmem:[%s6650_s3] sm:$0xff]  ;;  %s6655_s3 = sld [smem:[#allocation7_spill]] }
 0x60c   : > { %v2719_v31 = vpop.f32.mrf.mxu2  ;;  %3145 = vmatpush.bf16.msra.mxu0 %v5490_v25 }
 0x60d   : > { %v2750_v33 = vmul.f32 %v5699_v26, %v2747_v29  ;;  %v3180_v29 = vld [vmem:[%s6652_s6 + $0x38] sm:$0xff]  ;;  %v3177_v31 = vld [vmem:[%s6652_s6 + $0x20] sm:$0xff] }
 0x60e   : > { %3192 = vmatpush.msra.mxu2 %v3180_v29 }
 0x60f   : > { %v2753_v34 = vadd.f32 %v5700_v30, %v2750_v33  ;;  %v3179_v30 = vld [vmem:[%s6652_s6 + $0x30] sm:$0xff] }
 0x610   : > { %3193 = vmatpush.msra.mxu2 %v3179_v30  ;;  %v3175_v33 = vld [vmem:[%s6652_s6 + $0x10] sm:$0xff] }
 0x611   : > { %2759 = vrot.lane.b32.xlu1 %v2753_v34, %s6601_s1  ;;  %v2755_v36 = vrot.slane %v2753_v34, 7  ;;  %v3174_v34 = vld [vmem:[%s6652_s6 + $0x8] sm:$0xff]  ;;  %v3171_v56 = vld [vmem:[%s6655_s3] sm:$0xff] }
 0x612   : > { %v3009_v37 = vpop.f32.mrf.mxu3 }
 0x613   : > { %v2757_v38 = vsel %vm1551_vm8, 0.0, %v2755_v36  ;;  %v2758_v39 = vsel %vm1551_vm8, %v2755_v36, 0.0  ;;  %v5704_v36 = vld [vmem:[%s6653_s5] ss:$0 sm:$0xff] }
 0x614   : > { %v2764_v40 = vrot.slane %v2757_v38, 2  ;;  %v2765_v41 = vrot.slane %v2758_v39, 2 }
 0x616   : > { %v2766_v43 = vsel %vm953_vm1, %v2764_v40, %v2765_v41  ;;  %v5705_v40 = vld [vmem:[%s6653_s5 + $0x1] ss:$0 sm:$0xff] }
 0x617   : > { %v2775_v45 = vsel %vm1575_vm9, %v2766_v43, %v5656_v42  ;;  %v5706_v42 = vld [vmem:[%s6653_s5 + $0x2] ss:$0 sm:$0xff]  ;;  %s6656_s5 = sld [smem:[#allocation21_spill]] }
 0x618   : > { %v2778_v46 = vpack.c.bf16 %v2775_v45, %v2775_v45 }
 0x619   : > { %5669 = vrot.lane.b32.xlu1 %v5668_v44, %s6601_s1 }
 0x61a   : > { %2995 = vmatmul.bf16.vlgmr.msrb.gmra.mxu2 %v2778_v46  ;;  %v3011_v47 = vpop.f32.mrf.mxu3 }
 0x683   : > { %v2760_v49 = vpop.permute.xlu1 %2759 }
 0x684   : > { %v2774_v50 = vsel %vm1575_vm9, %v2757_v38, %v2760_v49 }
 0x685   : > { %v2777_v51 = vpack.c.bf16 %v2774_v50, %v2774_v50 }
 0x687   : > { %2982 = vmatmul.bf16.vlgmr.msrb.gmra.mxu1 %v2777_v51 }
 0x69d   : > { %v2996_v14 = vpop.f32.mrf.mxu2 }
 0x6a5   : > { %v2998_v16 = vpop.f32.mrf.mxu2 }
 0x704   : > { %v2983_v62 = vpop.f32.mrf.mxu1 }
 0x705   : > { %v2984_v63 = vadd.f32 %v5701_v60, %v2983_v62  ;;  %v5549_v62 = vld [vmem:[%s6656_s5 + $0xb8] sm:$0xff] }
 0x707   : > { %v2997_v0 = vadd.f32 %v2996_v14, %v2984_v63  ;;  %v3172_v63 = vld [vmem:[%s6655_s3 + $0x8] sm:$0xff]  ;;  %s6659_s3 = sld [smem:[#allocation23_spill]] }
 0x709   : > { %v3010_v17 = vadd.f32 %v3009_v37, %v2997_v0 }
 0x70b   : > { %v3013_v3 = vmax.f32 %v3010_v17, 0.0  ;;  %v5548_v17 = vld [vmem:[%s6656_s5 + $0xb0] sm:$0xff] }
 0x70c   : > { %v2985_v52 = vpop.f32.mrf.mxu1 }
 0x70d   : > { %v3016_v7 = vmul.f32 %v5702_v2, %v3013_v3 }
 0x70f   : > { %v3019_v8 = vadd.f32 %v5703_v4, %v3016_v7  ;;  %v5547_v4 = vld [vmem:[%s6656_s5 + $0xa8] sm:$0xff]  ;;  %v5546_v7 = vld [vmem:[%s6656_s5 + $0xa0] sm:$0xff] }
 0x711   : > { %3025 = vrot.lane.b32.xlu2 %v3019_v8, %s6601_s1  ;;  %v3021_v10 = vrot.slane %v3019_v8, 7 }
 0x713   : > { %v3023_v12 = vsel %vm1551_vm8, 0.0, %v3021_v10  ;;  %v3024_v13 = vsel %vm1551_vm8, %v3021_v10, 0.0  ;;  %v5545_v10 = vld [vmem:[%s6656_s5 + $0x98] sm:$0xff] }
 0x714   : > { %v3030_v15 = vrot.slane %v3023_v12, 2  ;;  %v3031_v18 = vrot.slane %v3024_v13, 2  ;;  %v5544_v13 = vld [vmem:[%s6656_s5 + $0x90] sm:$0xff] }
 0x716   : > { %v3032_v19 = vsel %vm953_vm1, %v3030_v15, %v3031_v18  ;;  %v5543_v15 = vld [vmem:[%s6656_s5 + $0x88] sm:$0xff]  ;;  %v5542_v18 = vld [vmem:[%s6656_s5 + $0x80] sm:$0xff] }
 0x717   : > { %v3036_v23 = vpack.c.bf16 %v3032_v19, %v3032_v19 }
 0x719   : > { %5659 = vrot.lane.b32.xlu2 %v5658_v22, %s6601_s1  ;;  %5010 = vmatmul.msk.bf16.vlgmr.msra.gmra.mxu1 %vm1575_vm9, %v3036_v23  ;;  %v3178_v22 = vld [vmem:[%s6652_s6 + $0x28] sm:$0xff]  ;;  %s6654_s1 = sld [smem:[#allocation19_spill]] }
 0x71a   : > { %3194 = vmatpush.msra.mxu2 %v3178_v22  ;;  %s6660_s6 = sld [smem:[#allocation22_spill]] }
 0x71c   : > { %3195 = vmatpush.msra.mxu2 %v3177_v31 }
 0x71e   : > { %3196 = vmatpush.msra.mxu2 %v3176_v32 }
 0x71f   : > { %v5517_v46 = vld [vmem:[%s6654_s1 + $0x78] sm:$0xff]  ;;  %v5516_v48 = vld [vmem:[%s6654_s1 + $0x70] sm:$0xff]  ;;  %v5515_v50 = vld [vmem:[%s6654_s1 + $0x68] sm:$0xff] }
 0x720   : > { %3197 = vmatpush.msra.mxu2 %v3175_v33  ;;  %v5509_v47 = vld [vmem:[%s6654_s1 + $0x38] sm:$0xff]  ;;  %3464 = vmatpush.bf16.msra.mxu3 %v5517_v46  ;;  %v5508_v49 = vld [vmem:[%s6654_s1 + $0x30] sm:$0xff]  ;;  %v5507_v51 = vld [vmem:[%s6654_s1 + $0x28] sm:$0xff] }
 0x721   : > { %3450 = vmatpush.bf16.msrb.mxu1 %v5509_v47  ;;  %v5514_v14 = vld [vmem:[%s6654_s1 + $0x60] sm:$0xff]  ;;  %v5513_v53 = vld [vmem:[%s6654_s1 + $0x58] sm:$0xff]  ;;  %v5512_v55 = vld [vmem:[%s6654_s1 + $0x50] sm:$0xff] }
 0x722   : > { %3198 = vmatpush.msra.mxu2 %v3174_v34  ;;  %v5506_v16 = vld [vmem:[%s6654_s1 + $0x20] sm:$0xff]  ;;  %v5505_v54 = vld [vmem:[%s6654_s1 + $0x18] sm:$0xff]  ;;  %v5511_v59 = vld [vmem:[%s6654_s1 + $0x48] sm:$0xff] }
 0x723   : > { %v5525_v57 = vld [vmem:[%s6654_s1 + $0xb8] sm:$0xff]  ;;  %v5524_v60 = vld [vmem:[%s6654_s1 + $0xb0] sm:$0xff]  ;;  %v5510_v61 = vld [vmem:[%s6654_s1 + $0x40] sm:$0xff] }
 0x724   : > { %3199 = vmatpush.msra.mxu2 %v3173_v35  ;;  %3465 = vmatpush.bf16.msra.mxu3 %v5516_v48  ;;  %v5523_v0 = vld [vmem:[%s6654_s1 + $0xa8] sm:$0xff]  ;;  %v5522_v1 = vld [vmem:[%s6654_s1 + $0xa0] sm:$0xff]  ;;  %v5521_v2 = vld [vmem:[%s6654_s1 + $0x98] sm:$0xff] }
 0x725   : > { %3451 = vmatpush.bf16.msrb.mxu1 %v5508_v49  ;;  %v5504_v3 = vld [vmem:[%s6654_s1 + $0x10] sm:$0xff]  ;;  %v5503_v52 = vld [vmem:[%s6654_s1 + $0x8] sm:$0xff]  ;;  %v5502_v9 = vld [vmem:[%s6654_s1] sm:$0xff] }
 0x726   : > { %v5520_v6 = vld [vmem:[%s6654_s1 + $0x90] sm:$0xff]  ;;  %v5519_v8 = vld [vmem:[%s6654_s1 + $0x88] sm:$0xff]  ;;  %v5533_v49 = vld [vmem:[%s6656_s5 + $0x38] sm:$0xff] }
 0x727   : > { %3742 = vmatpush.bf16.msrb.mxu0 %v5533_v49 }
 0x728   : > { %3466 = vmatpush.bf16.msra.mxu3 %v5515_v50 }
 0x729   : > { %3452 = vmatpush.bf16.msrb.mxu1 %v5507_v51  ;;  %v5532_v51 = vld [vmem:[%s6656_s5 + $0x30] sm:$0xff] }
 0x72b   : > { %3743 = vmatpush.bf16.msrb.mxu0 %v5532_v51 }
 0x72c   : > { %3467 = vmatpush.bf16.msra.mxu3 %v5514_v14 }
 0x72d   : > { %3453 = vmatpush.bf16.msrb.mxu1 %v5506_v16 }
 0x730   : > { %3468 = vmatpush.bf16.msra.mxu3 %v5513_v53 }
 0x731   : > { %3454 = vmatpush.bf16.msrb.mxu1 %v5505_v54  ;;  %v5531_v54 = vld [vmem:[%s6656_s5 + $0x28] sm:$0xff] }
 0x732   : > { %3744 = vmatpush.bf16.msrb.mxu0 %v5531_v54 }
 0x734   : > { %3469 = vmatpush.bf16.msra.mxu3 %v5512_v55 }
 0x735   : > { %3455 = vmatpush.bf16.msrb.mxu1 %v5504_v3 }
 0x738   : > { %3470 = vmatpush.bf16.msra.mxu3 %v5511_v59 }
 0x739   : > { %3456 = vmatpush.bf16.msrb.mxu1 %v5503_v52 }
 0x73c   : > { %3471 = vmatpush.bf16.msra.mxu3 %v5510_v61 }
 0x73d   : > { %3457 = vmatpush.bf16.msrb.mxu1 %v5502_v9 }
 0x740   : > { %3770 = vmatpush.bf16.msrb.mxu3 %v5549_v62 }
 0x744   : > { %3771 = vmatpush.bf16.msrb.mxu3 %v5548_v17 }
 0x748   : > { %3772 = vmatpush.bf16.msrb.mxu3 %v5547_v4  ;;  %v5528_v4 = vld [vmem:[%s6656_s5 + $0x10] sm:$0xff] }
 0x74c   : > { %3773 = vmatpush.bf16.msrb.mxu3 %v5546_v7 }
 0x750   : > { %3774 = vmatpush.bf16.msrb.mxu3 %v5545_v10 }
 0x754   : > { %3775 = vmatpush.bf16.msrb.mxu3 %v5544_v13  ;;  %v5670_v13 = vpop.permute.xlu1 %5669 }
 0x758   : > { %3776 = vmatpush.bf16.msrb.mxu3 %v5543_v15 }
 0x75c   : > { %3777 = vmatpush.bf16.msrb.mxu3 %v5542_v18 }
 0x76b   : > { %v3026_v26 = vpop.permute.xlu2 %3025 }
 0x76c   : > { %v3034_v27 = vsel %vm1575_vm9, %v3023_v12, %v3026_v26  ;;  %v5518_v12 = vld [vmem:[%s6654_s1 + $0x80] sm:$0xff]  ;;  %s6657_s1 = sld [smem:[#allocation20_spill]] }
 0x76d   : > { %v3035_v28 = vpack.c.bf16 %v3034_v27, %v3034_v27 }
 0x76f   : > { %3146 = vmatmul.bf16.vlgmr.msra.gmra.mxu0 %v3035_v28 }
 0x772   : > { %v5707_v46 = vld [vmem:[%s6657_s1] ss:$0 sm:$0xff]  ;;  %v5709_v62 = vld [vmem:[%s6657_s1 + $0x2] ss:$0 sm:$0xff] }
 0x773   : > { %v5660_v34 = vpop.permute.xlu2 %5659 }
 0x796   : > { %v3160_v20 = vpop.f32.mrf.mxu1 }
 0x79e   : > { %v3162_v21 = vpop.f32.mrf.mxu1 }
 0x7ec   : > { %v3147_v37 = vpop.f32.mrf.mxu0 }
 0x7ed   : > { %v3148_v38 = vadd.f32 %v5704_v36, %v3147_v37  ;;  %v5662_v36 = vunpack.i.h.bf16 %v5660_v34  ;;  %v5661_v37 = vunpack.i.l.bf16 %v5660_v34 }
 0x7ef   : > { %v3161_v39 = vadd.f32 %v3160_v20, %v3148_v38  ;;  %v3544_v38 = vsel %vm1575_vm9, %v6143_v11, %v5662_v36  ;;  %v3543_v24 = vsel %vm1575_vm9, %v6139_v5, %v5661_v37  ;;  %v5536_v11 = vld [vmem:[%s6656_s5 + $0x50] sm:$0xff]  ;;  %v5535_v5 = vld [vmem:[%s6656_s5 + $0x48] sm:$0xff]  ;;  %v5561_v37 = vld [vmem:[%s6659_s3 + $0x58] sm:$0xff] }
 0x7f1   : > { %v3164_v41 = vmax.f32 %v3161_v39, 0.0  ;;  %v3547_v39 = vpack.c.bf16 %v3544_v38, %v3543_v24  ;;  %v5560_v38 = vld [vmem:[%s6659_s3 + $0x50] sm:$0xff]  ;;  %v5559_v24 = vld [vmem:[%s6659_s3 + $0x48] sm:$0xff] }
 0x7f3   : > { %v3167_v43 = vmul.f32 %v5705_v40, %v3164_v41  ;;  %v5541_v40 = vld [vmem:[%s6656_s5 + $0x78] sm:$0xff]  ;;  %v5540_v41 = vld [vmem:[%s6656_s5 + $0x70] sm:$0xff] }
 0x7f4   : > { %v3149_v44 = vpop.f32.mrf.mxu0  ;;  %3756 = vmatpush.bf16.msra.mxu1 %v5541_v40  ;;  %v5710_v40 = vld [vmem:[%s6660_s6] ss:$0 sm:$0xff] }
 0x7f5   : > { %v3170_v45 = vadd.f32 %v5706_v42, %v3167_v43  ;;  %v5539_v42 = vld [vmem:[%s6656_s5 + $0x68] sm:$0xff]  ;;  %v5538_v43 = vld [vmem:[%s6656_s5 + $0x60] sm:$0xff]  ;;  %v5537_v44 = vld [vmem:[%s6656_s5 + $0x58] sm:$0xff] }
 0x7f7   : > { %5011 = vmatmul.msk.f32.vlgmr.msra.gmra.mxu2 %vm1575_vm9, %v3170_v45  ;;  %v5534_v45 = vld [vmem:[%s6656_s5 + $0x40] sm:$0xff] }
 0x7f8   : > { %3757 = vmatpush.bf16.msra.mxu1 %v5540_v41  ;;  %v5557_v41 = vld [vmem:[%s6659_s3 + $0x38] sm:$0xff] }
 0x7fc   : > { %3758 = vmatpush.bf16.msra.mxu1 %v5539_v42  ;;  %v5556_v42 = vld [vmem:[%s6659_s3 + $0x30] sm:$0xff] }
 0x800   : > { %3759 = vmatpush.bf16.msra.mxu1 %v5538_v43 }
 0x804   : > { %3760 = vmatpush.bf16.msra.mxu1 %v5537_v44 }
 0x808   : > { %3761 = vmatpush.bf16.msra.mxu1 %v5536_v11 }
 0x80c   : > { %3762 = vmatpush.bf16.msra.mxu1 %v5535_v5 }
 0x810   : > { %3763 = vmatpush.bf16.msra.mxu1 %v5534_v45 }
 0x87a   : > { %v3201_v58 = vpop.f32.mrf.mxu2 }
 0x87b   : > { %3226 = vmatpush.msrb.mxu2 %v3201_v58 }
 0x87c   : > { %5012 = vmatmul.msk.f32.vlgmr.msrb.gmra.mxu2 %vm3204_vm14, %v3171_v56  ;;  %v5708_v56 = vld [vmem:[%s6657_s1 + $0x1] ss:$0 sm:$0xff]  ;;  %s6658_s1 = smov 64  }
 0x87d   : > { %3478 = vmatpush.bf16.msra.mxu2 %v5525_v57 }
 0x881   : > { %3479 = vmatpush.bf16.msra.mxu2 %v5524_v60  ;;  %v5530_v60 = vld [vmem:[%s6656_s5 + $0x20] sm:$0xff] }
 0x882   : > { %3745 = vmatpush.bf16.msrb.mxu0 %v5530_v60 }
 0x884   : > { %5013 = vmatmul.msk.f32.gmra.mxu2 %vm3204_vm14, %v3172_v63 }
 0x885   : > { %3480 = vmatpush.bf16.msra.mxu2 %v5523_v0 }
 0x889   : > { %3481 = vmatpush.bf16.msra.mxu2 %v5522_v1  ;;  %v5529_v1 = vld [vmem:[%s6656_s5 + $0x18] sm:$0xff] }
 0x88a   : > { %3746 = vmatpush.bf16.msrb.mxu0 %v5529_v1  ;;  %v5551_v1 = vld [vmem:[%s6659_s3 + $0x8] sm:$0xff] }
 0x88d   : > { %3482 = vmatpush.bf16.msra.mxu2 %v5521_v2 }
 0x88e   : > { %3747 = vmatpush.bf16.msrb.mxu0 %v5528_v4 }
 0x891   : > { %3483 = vmatpush.bf16.msra.mxu2 %v5520_v6 }
 0x895   : > { %3484 = vmatpush.bf16.msra.mxu2 %v5519_v8  ;;  %v5527_v8 = vld [vmem:[%s6656_s5 + $0x8] sm:$0xff] }
 0x896   : > { %3748 = vmatpush.bf16.msrb.mxu0 %v5527_v8 }
 0x899   : > { %3485 = vmatpush.bf16.msra.mxu2 %v5518_v12 }
 0x89d   : > { %3924 = vmatpush.bf16.msrb.mxu2 %v5557_v41 }
 0x8a1   : > { %3925 = vmatpush.bf16.msrb.mxu2 %v5556_v42  ;;  %v5565_v42 = vld [vmem:[%s5963_s20 + $0x18] sm:$0xff] }
 0x8ff   : > { %v3228_v19 = vpop.f32.mrf.mxu2 }
 0x900   : > { %v3236_v23 = vrot.slane %v3228_v19, 7 }
 0x902   : > { %v3242_v26 = vsel %vm1551_vm8, 0.0, %v3236_v23 }
 0x903   : > { %v3246_v20 = vrot.slane %v3242_v26, 2  ;;  %v5672_v26 = vunpack.i.h.bf16 %v5670_v13 }
 0x907   : > { %v3231_v25 = vpop.f32.mrf.mxu2 }
 0x908   : > { %v3237_v27 = vrot.slane %v3231_v25, 7  ;;  %v3254_v28 = vpack.c.bf16 %v3231_v25, %v3228_v19 }
 0x90a   : > { %v3238_v29 = vsel %vm1551_vm8, %v3236_v23, %v3237_v27  ;;  %v3243_v30 = vsel %vm1551_vm8, %v3237_v27, 0.0  ;;  %3472 = vmatmul.bf16.vlgmr.msra.gmra.mxu3 %v3254_v28  ;;  %v5671_v27 = vunpack.i.l.bf16 %v5670_v13  ;;  %v5550_v13 = vld [vmem:[%s6659_s3] sm:$0xff] }
 0x90b   : > { %v3247_v21 = vrot.slane %v3238_v29, 2  ;;  %v3249_v22 = vrot.slane %v3243_v30, 2  ;;  %v5112_v31 = vpack.c.bf16 %v3238_v29, %v3236_v23 }
 0x90d   : > { %5113 = vmatmul.msk.bf16.vlgmr.msrb.gmra.mxu1 %vm6214_vm11, %v5112_v31  ;;  %v3248_v32 = vsel %vm953_vm1, %v3246_v20, %v3247_v21  ;;  %v3250_v33 = vsel %vm953_vm1, %v3247_v21, %v3249_v22  ;;  %v5526_v22 = vld [vmem:[%s6656_s5] sm:$0xff]  ;;  %s5574_s5 = sshll.u32 %s5996_s0, 4 }
 0x90e   : > { %v3255_v35 = vpack.c.bf16 %v3250_v33, %v3248_v32  ;;  %3749 = vmatpush.bf16.msrb.mxu0 %v5526_v22  ;;  %v5568_v22 = vld [vmem:[%s5963_s20 + $0x30] sm:$0xff] }
 0x910   : > { %3486 = vmatmul.bf16.vlgmr.msra.gmra.mxu2 %v3255_v35 }
 0x912   : > { %3942 = vmatpush.bf16.msra.mxu0 %v5561_v37 }
 0x916   : > { %3943 = vmatpush.bf16.msra.mxu0 %v5560_v38  ;;  %v5566_v38 = vld [vmem:[%s5963_s20 + $0x20] sm:$0xff] }
 0x91a   : > { %3778 = vmatmul.bf16.vlgmr.msrb.gmra.mxu3 %v3547_v39  ;;  %3944 = vmatpush.bf16.msra.mxu0 %v5559_v24  ;;  %v5558_v39 = vld [vmem:[%s6659_s3 + $0x40] sm:$0xff] }
 0x91e   : > { %3945 = vmatpush.bf16.msra.mxu0 %v5558_v39  ;;  %v5715_v39 = vld [vmem:[%s5958_s25 + $0x2] ss:$0 sm:$0xff] }
 0x98a   : > { %v3459_v47 = vpop.f32.mrf.mxu1 }
 0x98b   : > { %v3460_v50 = vadd.f32 %v5707_v46, %v3459_v47 }
 0x98d   : > { %v3473_v48 = vpop.f32.mrf.mxu3 }
 0x98e   : > { %v3474_v14 = vadd.f32 %v3473_v48, %v3460_v50  ;;  %v5711_v48 = vld [vmem:[%s6660_s6 + $0x1] ss:$0 sm:$0xff] }
 0x98f   : > { %v5554_v50 = vld [vmem:[%s6659_s3 + $0x20] sm:$0xff] }
 0x992   : > { %v3461_v16 = vpop.f32.mrf.mxu1 }
 0x993   : > { %v3487_v53 = vpop.f32.mrf.mxu2  ;;  %v3462_v57 = vadd.f32 %v5707_v46, %v3461_v16  ;;  %v5555_v46 = vld [vmem:[%s6659_s3 + $0x28] sm:$0xff] }
 0x994   : > { %v3488_v55 = vadd.f32 %v3487_v53, %v3474_v14  ;;  %3926 = vmatpush.bf16.msrb.mxu2 %v5555_v46  ;;  %v5712_v53 = vld [vmem:[%s6660_s6 + $0x2] ss:$0 sm:$0xff]  ;;  %s4134_s6 = scalar_lea.hbm %s5973_s21, %s5574_s5  ;;  %s5737_s5 = scalar_lea.hbm %s5973_s21, 32 }
 0x995   : > { %v3475_v59 = vpop.f32.mrf.mxu3  ;;  %s4137_s11 = sshll.u32 %s4134_s6, 4  ;;  %s4138_s11 = int_to_ptr.hbm [resolvable:$true] %s4137_s11 }
 0x996   : > { %v3492_v58 = vmax.f32 %v3488_v55, 0.0  ;;  %v3476_v63 = vadd.f32 %v3475_v59, %v3462_v57  ;;  %s5731_s12 = sshra.s32 %s4138_s11, 4  ;;  %s5732_s12 = int_to_ptr.hbm [resolvable:$true] %s5731_s12 }
 0x997   : > { %s5733_s0 = scalar_lea.hbm %s5732_s12, 16  ;;  %p5738_p0 = scmp.lt.s32.totalorder %s5732_s12, %s5973_s21 }
 0x998   : > { %v3496_v61 = vmul.f32 %v5708_v56, %v3492_v58  ;;  %3927 = vmatpush.bf16.msrb.mxu2 %v5554_v50  ;;  %p5734_p11 = scmp.ne.s32.totalorder %s5732_s12, %s5733_s0  ;;  %p5739_p1 = scmp.lt.s32.totalorder %s5737_s5, %s5733_s0 }
 0x99a   : > { %v3500_v17 = vadd.f32 %v5709_v62, %v3496_v61  ;;  %v5552_v61 = vld [vmem:[%s6659_s3 + $0x10] sm:$0xff]  ;;  %p5735_p12 = pnand %p5734_p11, %p6013_p5  ;;  %p5740_p2 = por %p5739_p1, %p5738_p0 }
 0x99b   : > { %v3489_v0 = vpop.f32.mrf.mxu2 }
 0x99c   : > { %v3490_v2 = vadd.f32 %v3489_v0, %v3476_v63  ;;  %v3504_v6 = vrot.slane %v3500_v17, 7  ;;  %p5736_p13 = pneg %p5735_p12 }
 0x99d   : > { %v3779_v5 = vpop.f32.mrf.mxu3 }
 0x99e   : > { %v3493_v3 = vmax.f32 %v3490_v2, 0.0  ;;  %v3510_v9 = vsel %vm1551_vm8, 0.0, %v3504_v6  ;;  %p5741_p3 = pnand %p5740_p2, %p5736_p13 }
 0x99f   : > { %v3520_v19 = vrot.slane %v3510_v9, 2 }
 0x9a0   : > { %v3497_v52 = vmul.f32 %v5708_v56, %v3493_v3  ;;  %v5553_v56 = vld [vmem:[%s6659_s3 + $0x18] sm:$0xff] }
 0x9a1   : > { %3928 = vmatpush.bf16.msrb.mxu2 %v5553_v56 }
 0x9a2   : > { %v3501_v7 = vadd.f32 %v5709_v62, %v3497_v52 }
 0x9a4   : > { %v3505_v10 = vrot.slane %v3501_v7, 7  ;;  %v5663_v12 = vpack.i.bf16 %v3501_v7, %v3500_v17 }
 0x9a5   : > { %v3781_v57 = vpop.f32.mrf.mxu3  ;;  %3929 = vmatpush.bf16.msrb.mxu2 %v5552_v61 }
 0x9a6   : > { %v3506_v15 = vsel %vm1551_vm8, %v3504_v6, %v3505_v10  ;;  %v3511_v18 = vsel %vm1551_vm8, %v3505_v10, 0.0  ;;  %5664 = vrot.lane.b32.xlu0 %v5663_v12, %s6658_s1 }
 0x9a7   : > { %v3521_v23 = vrot.slane %v3506_v15, 2  ;;  %v3523_v25 = vrot.slane %v3511_v18, 2 }
 0x9a9   : > { %v3522_v28 = vsel %vm953_vm1, %v3520_v19, %v3521_v23  ;;  %v3524_v29 = vsel %vm953_vm1, %v3521_v23, %v3523_v25  ;;  %3930 = vmatpush.bf16.msrb.mxu2 %v5551_v1 }
 0x9aa   : > { %v3541_v30 = vsel %vm1575_vm9, %v3522_v28, %v5671_v27  ;;  %v3542_v20 = vsel %vm1575_vm9, %v3524_v29, %v5672_v26  ;;  %v5573_v27 = vld [vmem:[%s5963_s20 + $0x58] sm:$0xff]  ;;  %v5572_v28 = vld [vmem:[%s5963_s20 + $0x50] sm:$0xff]  ;;  %v5571_v29 = vld [vmem:[%s5963_s20 + $0x48] sm:$0xff] }
 0x9ab   : > { %v3546_v21 = vpack.c.bf16 %v3542_v20, %v3541_v30  ;;  %4110 = vmatpush.bf16.msrb.mxu1 %v5573_v27  ;;  %v5570_v30 = vld [vmem:[%s5963_s20 + $0x40] sm:$0xff]  ;;  %v5569_v20 = vld [vmem:[%s5963_s20 + $0x38] sm:$0xff] }
 0x9ad   : > { %3764 = vmatmul.bf16.vlgmr.msra.gmra.mxu1 %v3546_v21  ;;  %3931 = vmatpush.bf16.msrb.mxu2 %v5550_v13  ;;  %v5713_v21 = vld [vmem:[%s5958_s25] ss:$0 sm:$0xff] }
 0x9af   : > { %4111 = vmatpush.bf16.msrb.mxu1 %v5572_v28 }
 0x9b3   : > { %4112 = vmatpush.bf16.msrb.mxu1 %v5571_v29 }
 0x9b7   : > { %4113 = vmatpush.bf16.msrb.mxu1 %v5570_v30 }
 0xa18   : > { %v5665_v31 = vpop.permute.xlu0 %5664 }
 0xa19   : > { %v5667_v32 = vunpack.i.h.bf16 %v5665_v31  ;;  %v5666_v33 = vunpack.i.l.bf16 %v5665_v31 }
 0xa1b   : > { %v3539_v34 = vsel %vm1575_vm9, %v3510_v9, %v5666_v33  ;;  %v3540_v35 = vsel %vm1575_vm9, %v3506_v15, %v5667_v32 }
 0xa1c   : > { %v3545_v36 = vpack.c.bf16 %v3540_v35, %v3539_v34  ;;  %v5567_v34 = vld [vmem:[%s5963_s20 + $0x28] sm:$0xff] }
 0xa1e   : > { %3750 = vmatmul.bf16.vlgmr.msrb.gmra.mxu0 %v3545_v36  ;;  %v5714_v36 = vld [vmem:[%s5958_s25 + $0x1] ss:$0 sm:$0xff] }
 0xa1f   : > { %4092 = vmatpush.bf16.msrb.mxu0 %v5569_v20 }
 0xa23   : > { %4093 = vmatpush.bf16.msrb.mxu0 %v5568_v22 }
 0xa27   : > { %4094 = vmatpush.bf16.msrb.mxu0 %v5567_v34 }
 0xa2a   : > { %v3765_v43 = vpop.f32.mrf.mxu1 }
 0xa2b   : > { %4095 = vmatpush.bf16.msrb.mxu0 %v5566_v38 }
 0xa2f   : > { %4096 = vmatpush.bf16.msrb.mxu0 %v5565_v42 }
 0xa32   : > { %v3767_v54 = vpop.f32.mrf.mxu1 }
 0xa9b   : > { %v3751_v44 = vpop.f32.mrf.mxu0 }
 0xa9c   : > { %v3752_v11 = vadd.f32 %v5710_v40, %v3751_v44 }
 0xa9e   : > { %v3766_v45 = vadd.f32 %v3765_v43, %v3752_v11 }
 0xaa0   : > { %v3780_v47 = vadd.f32 %v3779_v5, %v3766_v45  ;;  %v5564_v45 = vld [vmem:[%s5963_s20 + $0x10] sm:$0xff] }
 0xaa1   : > { %4097 = vmatpush.bf16.msrb.mxu0 %v5564_v45 }
 0xaa2   : > { %v3784_v49 = vmax.f32 %v3780_v47, 0.0 }
 0xaa3   : > { %v3753_v51 = vpop.f32.mrf.mxu0 }
 0xaa4   : > { %v3788_v14 = vmul.f32 %v5711_v48, %v3784_v49  ;;  %v3754_v16 = vadd.f32 %v5710_v40, %v3753_v51  ;;  %v5563_v49 = vld [vmem:[%s5963_s20 + $0x8] sm:$0xff] }
 0xaa5   : > { %4098 = vmatpush.bf16.msrb.mxu0 %v5563_v49 }
 0xaa6   : > { %v3768_v55 = vadd.f32 %v3767_v54, %v3754_v16  ;;  %v3792_v59 = vadd.f32 %v5712_v53, %v3788_v14 }
 0xaa8   : > { %v3782_v58 = vadd.f32 %v3781_v57, %v3768_v55  ;;  %v3796_v63 = vrot.slane %v3792_v59, 7 }
 0xaaa   : > { %v3785_v60 = vmax.f32 %v3782_v58, 0.0  ;;  %v3802_v3 = vsel %vm1551_vm8, 0.0, %v3796_v63 }
 0xaab   : > { %v3812_v7 = vrot.slane %v3802_v3, 2 }
 0xaac   : > { %v3789_v62 = vmul.f32 %v5711_v48, %v3785_v60  ;;  %v5562_v60 = vld [vmem:[%s5963_s20] sm:$0xff] }
 0xaad   : > { %4099 = vmatpush.bf16.msrb.mxu0 %v5562_v60 }
 0xaae   : > { %v3793_v0 = vadd.f32 %v5712_v53, %v3789_v62 }
 0xab0   : > { %v3797_v17 = vrot.slane %v3793_v0, 7  ;;  %v5673_v2 = vpack.i.bf16 %v3793_v0, %v3792_v59 }
 0xab2   : > { %v3803_v4 = vsel %vm1551_vm8, %v3797_v17, 0.0  ;;  %5674 = vrot.lane.b32.xlu2 %v5673_v2, %s6658_s1  ;;  %v3798_v6 = vsel %vm1551_vm8, %v3796_v63, %v3797_v17  ;;  %v5716_v2 = vld [vmem:[%s6661_s4] ss:$0 sm:$0xff] }
 0xab3   : > { %v3815_v52 = vrot.slane %v3803_v4, 2  ;;  %v3813_v8 = vrot.slane %v3798_v6, 2 }
 0xab5   : > { %v3814_v9 = vsel %vm953_vm1, %v3812_v7, %v3813_v8  ;;  %v3816_v10 = vsel %vm953_vm1, %v3813_v8, %v3815_v52 }
 0xab6   : > { %v3822_v12 = vpack.c.bf16 %v3816_v10, %v3814_v9 }
 0xab8   : > { %5258 = vmatmul.msk.bf16.vlgmr.msra.gmra.mxu0 %vm1575_vm9, %v3822_v12 }
 0xb0c   : > { %v5675_v15 = vpop.permute.xlu2 %5674 }
 0xb0d   : > { %v5677_v18 = vunpack.i.h.bf16 %v5675_v15  ;;  %v5676_v19 = vunpack.i.l.bf16 %v5675_v15 }
 0xb0f   : > { %v3819_v23 = vsel %vm1575_vm9, %v3802_v3, %v5676_v19  ;;  %v3820_v25 = vsel %vm1575_vm9, %v3798_v6, %v5677_v18 }
 0xb10   : > { %v3821_v26 = vpack.c.bf16 %v3820_v25, %v3819_v23 }
 0xb12   : > { %3932 = vmatmul.bf16.vlgmr.msrb.gmra.mxu2 %v3821_v26 }
 0xb35   : > { %v3947_v31 = vpop.f32.mrf.mxu0 }
 0xb3d   : > { %v3949_v43 = vpop.f32.mrf.mxu0 }
 0xb95   : > { %v3933_v32 = vpop.f32.mrf.mxu2 }
 0xb96   : > { %v3934_v33 = vadd.f32 %v5713_v21, %v3933_v32 }
 0xb98   : > { %v3948_v35 = vadd.f32 %v3947_v31, %v3934_v33 }
 0xb9a   : > { %v3952_v37 = vmax.f32 %v3948_v35, 0.0 }
 0xb9c   : > { %v3956_v24 = vmul.f32 %v5714_v36, %v3952_v37 }
 0xb9d   : > { %v3935_v40 = vpop.f32.mrf.mxu2 }
 0xb9e   : > { %v3936_v41 = vadd.f32 %v5713_v21, %v3935_v40  ;;  %v3960_v11 = vadd.f32 %v5715_v39, %v3956_v24 }
 0xba0   : > { %v3950_v44 = vadd.f32 %v3949_v43, %v3936_v41  ;;  %v3964_v47 = vrot.slane %v3960_v11, 7 }
 0xba2   : > { %v3953_v5 = vmax.f32 %v3950_v44, 0.0  ;;  %v3970_v14 = vsel %vm1551_vm8, 0.0, %v3964_v47 }
 0xba3   : > { %v3980_v55 = vrot.slane %v3970_v14, 2 }
 0xba4   : > { %v3957_v46 = vmul.f32 %v5714_v36, %v3953_v5 }
 0xba6   : > { %v3961_v48 = vadd.f32 %v5715_v39, %v3957_v46 }
 0xba8   : > { %v3965_v50 = vrot.slane %v3961_v48, 7  ;;  %v5678_v51 = vpack.i.bf16 %v3961_v48, %v3960_v11 }
 0xbaa   : > { %v3971_v16 = vsel %vm1551_vm8, %v3965_v50, 0.0  ;;  %5679 = vrot.lane.b32.xlu0 %v5678_v51, %s6658_s1  ;;  %v3966_v53 = vsel %vm1551_vm8, %v3964_v47, %v3965_v50  ;;  %s921_s1 = sand.u32 1, %s5771_s16  }
 0xbab   : > { %v3983_v54 = vrot.slane %v3971_v16, 2  ;;  %v3981_v56 = vrot.slane %v3966_v53, 2  ;;  %s4234_s3 = sshll.u32 %s921_s1, 4  ;;  %s4123_s4 = scalar_lea.sflag [#allocation3], %s921_s1 }
 0xbac   : > { %s923_s8 = scalar_lea.vmem [#allocation2], %s4234_s3 }
 0xbad   : > { %v3982_v57 = vsel %vm953_vm1, %v3980_v55, %v3981_v56  ;;  %v3984_v58 = vsel %vm953_vm1, %v3981_v56, %v3983_v54  ;;  %s4135_s9 = sshll.u32 %s923_s8, 4  ;;  %s4136_s9 = int_to_ptr.vmem [resolvable:$true] %s4135_s9 }
 0xbae   : > { %v3990_v59 = vpack.c.bf16 %v3984_v58, %v3982_v57 }
 0xbb0   : > { %5307 = vmatmul.msk.bf16.vlgmr.msrb.gmra.mxu1 %vm1575_vm9, %v3990_v59 }
 0xc1c   : > { %v5680_v61 = vpop.permute.xlu0 %5679 }
 0xc1d   : > { %v5682_v62 = vunpack.i.h.bf16 %v5680_v61  ;;  %v5681_v63 = vunpack.i.l.bf16 %v5680_v61 }
 0xc1f   : > { %v3987_v0 = vsel %vm1575_vm9, %v3970_v14, %v5681_v63  ;;  %v3988_v1 = vsel %vm1575_vm9, %v3966_v53, %v5682_v62 }
 0xc20   : > { %v3989_v17 = vpack.c.bf16 %v3988_v1, %v3987_v0 }
 0xc22   : > { %4100 = vmatmul.bf16.vlgmr.msrb.gmra.mxu0 %v3989_v17 }
 0xc2d   : > { %v4115_v3 = vpop.f32.mrf.mxu1 }
 0xc35   : > { %v4117_v9 = vpop.f32.mrf.mxu1 }
 0xc9f   : > { %v4101_v4 = vpop.f32.mrf.mxu0 }
 0xca0   : > { %v4102_v6 = vadd.f32 %v5716_v2, %v4101_v4 }
 0xca2   : > { %v4116_v52 = vadd.f32 %v4115_v3, %v4102_v6 }
 0xca4   : > { %4120 = vst [vmem:[%s923_s8] sm:$0xff] %v4116_v52 }
 0xca7   : > { %v4103_v7 = vpop.f32.mrf.mxu0 }
 0xca8   : > { %v4104_v8 = vadd.f32 %v5716_v2, %v4103_v7 }
 0xcaa   : > { %v4118_v10 = vadd.f32 %v4117_v9, %v4104_v8 }
 0xcac   : > { %4121 = vst [vmem:[%s923_s8 + $0x8] sm:$0xff] %v4118_v10 }
 0xcad   : > { %5744 = shalt.err (!%p5741_p3)
}
 0xcae   : > { %s5813_s3 = smov 128   ;;  %s5814_s6 = smov 8  }
 0xcaf   : > { %5575 = dma.vmem_to_hbm [thread:$0]  (%p6013_p5), %s4136_s9, 256, %s4138_s11, %s4123_s4, %s5813_s3, %s5813_s3, %s5814_s6  }
 0xcb0 PF: > { %p5581_p4 = scmp.ge.s32.totalorder %s5779_s22, 2  ;;  %s4152_s8 = sand.u32 1, %s5767_s15  }
 0xcb1   : > { %s4153_s1 = scalar_lea.sflag [#allocation3], %s4152_s8 }
 0xcb2   : > { %p5578_p7 = pnand %p5581_p4, %p6017_p6 }
 0xcb4   : > { %p5579_p8 = pneg %p5578_p7 }
 0xcb6   : > { %5762 = dma.done.wait (%p5579_p8), %s4153_s1, 256  }
 0xcb7   : > { %5764 = vsyncadd (%p5579_p8), %s4153_s1, 4294967040  ;;  %p71_p9 = scmp.ge.s32.totalorder %s6000_s26, 4   ;;  %s6662_s15 = smov %s5771_s16 }
 0xcb8   : > { %s6663_s16 = smov %s5775_s18  ;;  %s6664_s18 = smov %s6011_s2 }
 0xcb9   : > { %s6665_s22 = smov %s6000_s26  ;;  %73 = sbr.rel (!%p71_p9) target bundleno = 61 (0x3d), region = 205 }
 0xcbe   :  { %4159 = vsyncpa [#allocation3], 1 }
 0xcbf   :  { %4161 = vsyncpa [#allocation3 + $0x1], 1 }

</bundles_post_ra>
